<compile_context>
chip_gen: v5e
topology: v5e:2x2
jax: 0.10.0
libtpu: 0.0.40
codegen_flags: <defaults>
</compile_context>

<pallas_src>
import jax
import jax.numpy as jnp
from jax.experimental import pallas as pl
from jax.experimental.pallas import tpu as pltpu

# ----------------------------- config ---------------------------------------
LAYER_NUM = 4
PRIORS = 32            # analog of 128
NUM_CLASSES = 8        # config['dataset']['num_classes']
B = 2
C_IN = 64              # analog of 512 (pyramid feature channels)
C_DEE = 32             # analog of 256 (dee hidden channels)
C_HEAD = 32            # detection-head hidden channels
GLOBAL_LEN = 512       # analog of 2048 (global feature temporal length)
INPUT_T = 2 * PRIORS   # first stride-2 conv maps INPUT_T -> PRIORS
N_OUT = 2 + NUM_CLASSES  # merged loc(2) || conf(NUM_CLASSES) lanes

LEVEL_LENS = [PRIORS // (2 ** i) for i in range(LAYER_NUM)]    # [32, 16, 8, 4]
LEVEL_OFFS = [sum(LEVEL_LENS[:i]) for i in range(LAYER_NUM)]   # [0, 32, 48, 56]
TOTAL_P = sum(LEVEL_LENS)                                      # 60
P_PAD = 64                                                     # dense-store pad


# ----------------------------- in-kernel helpers -----------------------------
def _shift3_cat(x):
    """Build the fused k=3 (pad=1) operand [x[t-1] | x[t] | x[t+1]] (T, 3*C)."""
    zero = jnp.zeros((1, x.shape[1]), x.dtype)
    prev = jnp.concatenate([zero, x[:-1]], axis=0)
    nxt = jnp.concatenate([x[1:], zero], axis=0)
    return jnp.concatenate([prev, x, nxt], axis=-1)


# ----------------------------- fused kernel ----------------------------------
def _pyramid_detection_kernel(feat_ref, glob_ref, sel_ref, gw_ref,
                              dw1_ref, db1_ref, dw2_ref, db2_ref,
                              wt_ref, bt_ref, wlc_ref, blc_ref, sv_ref,
                              out_ref):
    # Gaussian-pooled global feature for ALL levels: one matmul per batch.
    pooled = jnp.dot(gw_ref[...], glob_ref[0],
                     preferred_element_type=jnp.float32)         # (P_PAD, C_IN) f32

    # Hoisted loc-lane mask for ScaleExp (built once, reused by every level).
    loc_mask = jax.lax.broadcasted_iota(jnp.int32, (1, N_OUT), 1) < 2

    x = feat_ref[0]                                              # (INPUT_T, C_IN) bf16
    outs = []
    for i in range(LAYER_NUM):                                   # unrolled at trace time
        T = INPUT_T >> i
        To = T // 2
        off = LEVEL_OFFS[i]

        # ---- dee: k=3 stride=2 pad=1 conv (C_IN -> C_DEE), taps fused -------
        y_full = jnp.dot(_shift3_cat(x), dw1_ref[i],
                         preferred_element_type=jnp.float32)     # (T, C_DEE)
        y_full = jnp.maximum(y_full + db1_ref[i], 0.0)           # bias + ReLU in f32
        # stride-2 via exact 0/1 even-row selection matrix (host-precomputed).
        y = jnp.dot(sel_ref[:To, :T], y_full.astype(jnp.bfloat16),
                    preferred_element_type=jnp.float32)          # (To, C_DEE)

        # ---- dee: k=1 conv (C_DEE -> C_IN) + ReLU  -> next-level input ------
        xf = jnp.dot(y.astype(jnp.bfloat16), dw2_ref[i],
                     preferred_element_type=jnp.float32) + db2_ref[i]
        xf = jnp.maximum(xf, 0.0)                                # (To, C_IN) f32
        x = xf.astype(jnp.bfloat16)

        # ---- GaussianSampling: fuse gaussian-pooled global feature ----------
        p = (xf + pooled[off:off + To]).astype(jnp.bfloat16)     # (To, C_IN)

        # ---- detection head: shared tower conv k=3 s=1 pad=1 + ReLU ---------
        tower = jnp.dot(_shift3_cat(p), wt_ref[...],
                        preferred_element_type=jnp.float32)      # (To, C_HEAD)
        tower = jnp.maximum(tower + bt_ref[...], 0.0)

        # ---- merged loc||conf conv k=3 s=1 pad=1 (C_HEAD -> 2+NC) -----------
        head = jnp.dot(_shift3_cat(tower.astype(jnp.bfloat16)), wlc_ref[...],
                       preferred_element_type=jnp.float32) + blc_ref[...]

        # ---- ScaleExp on the 2 loc lanes only --------------------------------
        # sv_ref[i] == [s_i, s_i, 0, ..., 0]  =>  exp() arg is 0 on conf lanes.
        outs.append(jnp.where(loc_mask, jnp.exp(head * sv_ref[i]), head))

    # Single dense store per batch (padded to a tile-aligned sublane count).
    res = jnp.concatenate(outs, axis=0)                          # (TOTAL_P, N_OUT)
    pad = jnp.zeros((P_PAD - TOTAL_P, N_OUT), jnp.float32)
    out_ref[0] = jnp.concatenate([res, pad], axis=0)


# ----------------------------- params / wrapper ------------------------------
def gaussian_weights(L, G):
    """Row-normalized gaussian pooling matrix: each of L positions pools a
    window of radius r = G // L over the global feature."""
    r = G // L
    centers = (jnp.arange(L, dtype=jnp.float32) + 0.5) * r
    t = jnp.arange(G, dtype=jnp.float32) + 0.5
    sigma = r / 2.0
    w = jnp.exp(-0.5 * ((t[None, :] - centers[:, None]) / sigma) ** 2)
    return (w / jnp.sum(w, axis=1, keepdims=True)).astype(jnp.float32)


def init_params(key):
    keys = iter(jax.random.split(key, 12))

    def rnd(shape):
        return 0.05 * jax.random.normal(next(keys), shape, jnp.float32)

    # Stacked (and row-padded) gaussian pooling weights for all levels.
    gw = jnp.concatenate([gaussian_weights(L, GLOBAL_LEN) for L in LEVEL_LENS],
                         axis=0)                                  # (TOTAL_P, GLOBAL_LEN)
    gw = jnp.concatenate(
        [gw, jnp.zeros((P_PAD - TOTAL_P, GLOBAL_LEN), jnp.float32)], axis=0)

    # Exact 0/1 even-row selection matrix shared by all levels (sliced per level).
    rows = jnp.arange(PRIORS)[:, None]
    cols = jnp.arange(INPUT_T)[None, :]
    sel = (cols == 2 * rows).astype(jnp.float32)                  # (PRIORS, INPUT_T)

    # ScaleExp: per-level [s, s, 0, ..., 0] row (scale init 1.0).
    scale_vec = jnp.zeros((LAYER_NUM, 1, N_OUT), jnp.float32).at[:, :, :2].set(1.0)

    return {
        # matmul operands in bf16 (MXU path); biases / scale rows stay f32.
        "sel": sel.astype(jnp.bfloat16),
        "gw": gw.astype(jnp.bfloat16),
        # k=3 stride-2 conv, 3 taps stacked along K: [w(t-1); w(t); w(t+1)].
        "dw1": rnd((LAYER_NUM, 3 * C_IN, C_DEE)).astype(jnp.bfloat16),
        "db1": rnd((LAYER_NUM, 1, C_DEE)),
        "dw2": rnd((LAYER_NUM, C_DEE, C_IN)).astype(jnp.bfloat16),   # k=1 conv
        "db2": rnd((LAYER_NUM, 1, C_IN)),
        "wt": rnd((3 * C_IN, C_HEAD)).astype(jnp.bfloat16),          # shared tower conv
        "bt": rnd((1, C_HEAD)),
        "wlc": rnd((3 * C_HEAD, N_OUT)).astype(jnp.bfloat16),        # merged loc||conf conv
        "blc": rnd((1, N_OUT)),
        "scale_vec": scale_vec,
    }


def pyramid_detection_forward(params, feat_btc, global_btc):
    """feat_btc: (B, INPUT_T, C_IN), global_btc: (B, GLOBAL_LEN, C_IN).
    Returns (loc (B, P, 2), conf (B, P, num_classes), priors (1, P, 1))."""
    global_btc = jax.lax.stop_gradient(global_btc)     # global_feat.detach()

    out = pl.pallas_call(
        _pyramid_detection_kernel,
        out_shape=jax.ShapeDtypeStruct((B, P_PAD, N_OUT), jnp.float32),
        grid=(B,),
        in_specs=[
            pl.BlockSpec((1, INPUT_T, C_IN), lambda b: (b, 0, 0)),      # feat (per batch)
            pl.BlockSpec((1, GLOBAL_LEN, C_IN), lambda b: (b, 0, 0)),   # global (per batch)
            pl.BlockSpec((PRIORS, INPUT_T), lambda b: (0, 0)),          # even-row selector
            pl.BlockSpec((P_PAD, GLOBAL_LEN), lambda b: (0, 0)),        # stacked gauss W
            pl.BlockSpec((LAYER_NUM, 3 * C_IN, C_DEE), lambda b: (0, 0, 0)),
            pl.BlockSpec((LAYER_NUM, 1, C_DEE), lambda b: (0, 0, 0)),
            pl.BlockSpec((LAYER_NUM, C_DEE, C_IN), lambda b: (0, 0, 0)),
            pl.BlockSpec((LAYER_NUM, 1, C_IN), lambda b: (0, 0, 0)),
            pl.BlockSpec((3 * C_IN, C_HEAD), lambda b: (0, 0)),
            pl.BlockSpec((1, C_HEAD), lambda b: (0, 0)),
            pl.BlockSpec((3 * C_HEAD, N_OUT), lambda b: (0, 0)),
            pl.BlockSpec((1, N_OUT), lambda b: (0, 0)),
            pl.BlockSpec((LAYER_NUM, 1, N_OUT), lambda b: (0, 0, 0)),   # ScaleExp rows
        ],
        out_specs=pl.BlockSpec((1, P_PAD, N_OUT), lambda b: (b, 0, 0)),
        compiler_params=pltpu.CompilerParams(
            dimension_semantics=("parallel",),   # batch -> 2 TCs on v7x
        ),
    )(feat_btc.astype(jnp.bfloat16),
      global_btc.astype(jnp.bfloat16),
      params["sel"], params["gw"],
      params["dw1"], params["db1"], params["dw2"], params["db2"],
      params["wt"], params["bt"], params["wlc"], params["blc"],
      params["scale_vec"])

    out = out[:, :TOTAL_P, :]                  # drop the P_PAD padding rows
    loc = out[:, :, :2]                        # (B, TOTAL_P, 2)
    conf = out[:, :, 2:]                       # (B, TOTAL_P, NUM_CLASSES)

    prior_chunks = []
    t = PRIORS
    for _ in range(LAYER_NUM):
        prior_chunks.append(((jnp.arange(t, dtype=jnp.float32) + 0.5) / t).reshape(-1, 1))
        t //= 2
    priors = jnp.concatenate(prior_chunks, axis=0)[None]   # (1, TOTAL_P, 1)
    return loc, conf, priors


# ----------------------------- demo ------------------------------------------
if __name__ == "__main__":
    key = jax.random.PRNGKey(0)
    k_x, k_g, k_p = jax.random.split(key, 3)

    # PyTorch-layout (NCT) inputs, transposed to the kernel layout (B, T, C).
    feat_nct = jax.random.normal(k_x, (B, C_IN, INPUT_T), jnp.float32)
    global_nct = jax.random.normal(k_g, (B, C_IN, GLOBAL_LEN), jnp.float32)
    feat_btc = jnp.transpose(feat_nct, (0, 2, 1))
    global_btc = jnp.transpose(global_nct, (0, 2, 1))

    params = init_params(k_p)

    fwd = jax.jit(pyramid_detection_forward)
    loc, conf, priors = fwd(params, feat_btc, global_btc)
    jax.block_until_ready((loc, conf, priors))

    assert loc.shape == (B, TOTAL_P, 2), loc.shape
    assert conf.shape == (B, TOTAL_P, NUM_CLASSES), conf.shape
    assert priors.shape == (1, TOTAL_P, 1), priors.shape
    assert bool(jnp.all(jnp.isfinite(loc))) and bool(jnp.all(jnp.isfinite(conf)))

    print("KERNEL_OK")
</pallas_src>

<mosaic_0001>
module attributes {stable_mosaic.version = 11 : i64} {
  func.func @_pyramid_detection_kernel(%arg0: i32, %arg1: memref<1x64x64xbf16, #tpu.memory_space<vmem>>, %arg2: memref<1x512x64xbf16, #tpu.memory_space<vmem>>, %arg3: memref<32x64xbf16, #tpu.memory_space<vmem>>, %arg4: memref<64x512xbf16, #tpu.memory_space<vmem>>, %arg5: memref<4x192x32xbf16, #tpu.memory_space<vmem>>, %arg6: memref<4x1x32xf32, #tpu.memory_space<vmem>>, %arg7: memref<4x32x64xbf16, #tpu.memory_space<vmem>>, %arg8: memref<4x1x64xf32, #tpu.memory_space<vmem>>, %arg9: memref<192x32xbf16, #tpu.memory_space<vmem>>, %arg10: memref<1x32xf32, #tpu.memory_space<vmem>>, %arg11: memref<96x10xbf16, #tpu.memory_space<vmem>>, %arg12: memref<1x10xf32, #tpu.memory_space<vmem>>, %arg13: memref<4x1x10xf32, #tpu.memory_space<vmem>>, %arg14: memref<1x64x10xf32, #tpu.memory_space<vmem>>) attributes {dimension_semantics = [#tpu.dimension_semantics<parallel>], iteration_bounds = array<i64: 2>, scalar_prefetch = 0 : i64, scratch_operands = 0 : i64, tpu.core_type = #tpu.core_type<tc>, window_params = [{transform_indices = @transform_0, window_bounds = array<i64: 1, 64, 64>}, {transform_indices = @transform_1, window_bounds = array<i64: 1, 512, 64>}, {pipeline_mode = #tpu.pipeline_mode<synchronous>, transform_indices = @transform_2, window_bounds = array<i64: 32, 64>}, {pipeline_mode = #tpu.pipeline_mode<synchronous>, transform_indices = @transform_3, window_bounds = array<i64: 64, 512>}, {pipeline_mode = #tpu.pipeline_mode<synchronous>, transform_indices = @transform_4, window_bounds = array<i64: 4, 192, 32>}, {pipeline_mode = #tpu.pipeline_mode<synchronous>, transform_indices = @transform_5, window_bounds = array<i64: 4, 1, 32>}, {pipeline_mode = #tpu.pipeline_mode<synchronous>, transform_indices = @transform_6, window_bounds = array<i64: 4, 32, 64>}, {pipeline_mode = #tpu.pipeline_mode<synchronous>, transform_indices = @transform_7, window_bounds = array<i64: 4, 1, 64>}, {pipeline_mode = #tpu.pipeline_mode<synchronous>, transform_indices = @transform_8, window_bounds = array<i64: 192, 32>}, {pipeline_mode = #tpu.pipeline_mode<synchronous>, transform_indices = @transform_9, window_bounds = array<i64: 1, 32>}, {pipeline_mode = #tpu.pipeline_mode<synchronous>, transform_indices = @transform_10, window_bounds = array<i64: 96, 10>}, {pipeline_mode = #tpu.pipeline_mode<synchronous>, transform_indices = @transform_11, window_bounds = array<i64: 1, 10>}, {pipeline_mode = #tpu.pipeline_mode<synchronous>, transform_indices = @transform_12, window_bounds = array<i64: 4, 1, 10>}, {transform_indices = @transform_13, window_bounds = array<i64: 1, 64, 10>}]} {
    %c0 = arith.constant 0 : index
    %c0_0 = arith.constant 0 : index
    %0 = vector.load %arg4[%c0, %c0_0] : memref<64x512xbf16, #tpu.memory_space<vmem>>, vector<64x512xbf16>
    %c0_1 = arith.constant 0 : index
    %c0_2 = arith.constant 0 : index
    %c0_3 = arith.constant 0 : index
    %1 = vector.load %arg2[%c0_1, %c0_2, %c0_3] : memref<1x512x64xbf16, #tpu.memory_space<vmem>>, vector<1x512x64xbf16>
    %2 = vector.shape_cast %1 : vector<1x512x64xbf16> to vector<512x64xbf16>
    %cst = arith.constant dense<0.000000e+00> : vector<64x64xf32>
    %3 = tpu.matmul %0, %2, %cst {dimension_numbers = #tpu.dot_dimension_numbers<[1], [0], [0], [1], [0, 0, 1, 1], [], []>} : vector<64x512xbf16>, vector<512x64xbf16>, vector<64x64xf32> -> vector<64x64xf32>
    %4 = tpu.iota {dimensions = array<i32: 1>} : vector<1x10xi32>
    %c2_i32 = arith.constant 2 : i32
    %5 = vector.broadcast %c2_i32 : i32 to vector<1x10xi32>
    %6 = arith.cmpi slt, %4, %5 : vector<1x10xi32>
    %c0_4 = arith.constant 0 : index
    %c0_5 = arith.constant 0 : index
    %c0_6 = arith.constant 0 : index
    %7 = vector.load %arg1[%c0_4, %c0_5, %c0_6] : memref<1x64x64xbf16, #tpu.memory_space<vmem>>, vector<1x64x64xbf16>
    %8 = vector.shape_cast %7 : vector<1x64x64xbf16> to vector<64x64xbf16>
    %cst_7 = arith.constant 0.000000e+00 : bf16
    %9 = vector.broadcast %cst_7 : bf16 to vector<1x64xbf16>
    %10 = vector.extract_strided_slice %8 {offsets = [0, 0], sizes = [63, 64], strides = [1, 1]} : vector<64x64xbf16> to vector<63x64xbf16>
    %11 = tpu.concatenate %9, %10 in 0 : vector<1x64xbf16>, vector<63x64xbf16> -> vector<64x64xbf16>
    %12 = vector.extract_strided_slice %8 {offsets = [1, 0], sizes = [63, 64], strides = [1, 1]} : vector<64x64xbf16> to vector<63x64xbf16>
    %13 = tpu.concatenate %12, %9 in 0 : vector<63x64xbf16>, vector<1x64xbf16> -> vector<64x64xbf16>
    %14 = tpu.concatenate %11, %8, %13 in 1 : vector<64x64xbf16>, vector<64x64xbf16>, vector<64x64xbf16> -> vector<64x192xbf16>
    %c0_8 = arith.constant 0 : index
    %c0_9 = arith.constant 0 : index
    %c0_10 = arith.constant 0 : index
    %15 = vector.load %arg5[%c0_8, %c0_9, %c0_10] : memref<4x192x32xbf16, #tpu.memory_space<vmem>>, vector<1x192x32xbf16>
    %16 = vector.shape_cast %15 : vector<1x192x32xbf16> to vector<192x32xbf16>
    %cst_11 = arith.constant dense<0.000000e+00> : vector<64x32xf32>
    %17 = tpu.matmul %14, %16, %cst_11 {dimension_numbers = #tpu.dot_dimension_numbers<[1], [0], [0], [1], [0, 0, 1, 1], [], []>} : vector<64x192xbf16>, vector<192x32xbf16>, vector<64x32xf32> -> vector<64x32xf32>
    %c0_12 = arith.constant 0 : index
    %c0_13 = arith.constant 0 : index
    %c0_14 = arith.constant 0 : index
    %18 = vector.load %arg6[%c0_12, %c0_13, %c0_14] : memref<4x1x32xf32, #tpu.memory_space<vmem>>, vector<1x1x32xf32>
    %19 = vector.shape_cast %18 : vector<1x1x32xf32> to vector<1x32xf32>
    %20 = vector.broadcast %19 : vector<1x32xf32> to vector<64x32xf32>
    %21 = arith.addf %17, %20 : vector<64x32xf32>
    %cst_15 = arith.constant 0.000000e+00 : f32
    %22 = vector.broadcast %cst_15 : f32 to vector<64x32xf32>
    %23 = arith.maximumf %21, %22 : vector<64x32xf32>
    %c0_16 = arith.constant 0 : index
    %c0_17 = arith.constant 0 : index
    %24 = vector.load %arg3[%c0_16, %c0_17] : memref<32x64xbf16, #tpu.memory_space<vmem>>, vector<32x64xbf16>
    %25 = arith.truncf %23 : vector<64x32xf32> to vector<64x32xbf16>
    %cst_18 = arith.constant dense<0.000000e+00> : vector<32x32xf32>
    %26 = tpu.matmul %24, %25, %cst_18 {dimension_numbers = #tpu.dot_dimension_numbers<[1], [0], [0], [1], [0, 0, 1, 1], [], []>} : vector<32x64xbf16>, vector<64x32xbf16>, vector<32x32xf32> -> vector<32x32xf32>
    %27 = arith.truncf %26 : vector<32x32xf32> to vector<32x32xbf16>
    %c0_19 = arith.constant 0 : index
    %c0_20 = arith.constant 0 : index
    %c0_21 = arith.constant 0 : index
    %28 = vector.load %arg7[%c0_19, %c0_20, %c0_21] : memref<4x32x64xbf16, #tpu.memory_space<vmem>>, vector<1x32x64xbf16>
    %29 = vector.shape_cast %28 : vector<1x32x64xbf16> to vector<32x64xbf16>
    %cst_22 = arith.constant dense<0.000000e+00> : vector<32x64xf32>
    %30 = tpu.matmul %27, %29, %cst_22 {dimension_numbers = #tpu.dot_dimension_numbers<[1], [0], [0], [1], [0, 0, 1, 1], [], []>} : vector<32x32xbf16>, vector<32x64xbf16>, vector<32x64xf32> -> vector<32x64xf32>
    %c0_23 = arith.constant 0 : index
    %c0_24 = arith.constant 0 : index
    %c0_25 = arith.constant 0 : index
    %31 = vector.load %arg8[%c0_23, %c0_24, %c0_25] : memref<4x1x64xf32, #tpu.memory_space<vmem>>, vector<1x1x64xf32>
    %32 = vector.shape_cast %31 : vector<1x1x64xf32> to vector<1x64xf32>
    %33 = vector.broadcast %32 : vector<1x64xf32> to vector<32x64xf32>
    %34 = arith.addf %30, %33 : vector<32x64xf32>
    %cst_26 = arith.constant 0.000000e+00 : f32
    %35 = vector.broadcast %cst_26 : f32 to vector<32x64xf32>
    %36 = arith.maximumf %34, %35 : vector<32x64xf32>
    %37 = arith.truncf %36 : vector<32x64xf32> to vector<32x64xbf16>
    %38 = vector.extract_strided_slice %3 {offsets = [0, 0], sizes = [32, 64], strides = [1, 1]} : vector<64x64xf32> to vector<32x64xf32>
    %39 = arith.addf %36, %38 : vector<32x64xf32>
    %40 = arith.truncf %39 : vector<32x64xf32> to vector<32x64xbf16>
    %cst_27 = arith.constant 0.000000e+00 : bf16
    %41 = vector.broadcast %cst_27 : bf16 to vector<1x64xbf16>
    %42 = vector.extract_strided_slice %40 {offsets = [0, 0], sizes = [31, 64], strides = [1, 1]} : vector<32x64xbf16> to vector<31x64xbf16>
    %43 = tpu.concatenate %41, %42 in 0 : vector<1x64xbf16>, vector<31x64xbf16> -> vector<32x64xbf16>
    %44 = vector.extract_strided_slice %40 {offsets = [1, 0], sizes = [31, 64], strides = [1, 1]} : vector<32x64xbf16> to vector<31x64xbf16>
    %45 = tpu.concatenate %44, %41 in 0 : vector<31x64xbf16>, vector<1x64xbf16> -> vector<32x64xbf16>
    %46 = tpu.concatenate %43, %40, %45 in 1 : vector<32x64xbf16>, vector<32x64xbf16>, vector<32x64xbf16> -> vector<32x192xbf16>
    %c0_28 = arith.constant 0 : index
    %c0_29 = arith.constant 0 : index
    %47 = vector.load %arg9[%c0_28, %c0_29] : memref<192x32xbf16, #tpu.memory_space<vmem>>, vector<192x32xbf16>
    %cst_30 = arith.constant dense<0.000000e+00> : vector<32x32xf32>
    %48 = tpu.matmul %46, %47, %cst_30 {dimension_numbers = #tpu.dot_dimension_numbers<[1], [0], [0], [1], [0, 0, 1, 1], [], []>} : vector<32x192xbf16>, vector<192x32xbf16>, vector<32x32xf32> -> vector<32x32xf32>
    %c0_31 = arith.constant 0 : index
    %c0_32 = arith.constant 0 : index
    %49 = vector.load %arg10[%c0_31, %c0_32] : memref<1x32xf32, #tpu.memory_space<vmem>>, vector<1x32xf32>
    %50 = vector.broadcast %49 : vector<1x32xf32> to vector<32x32xf32>
    %51 = arith.addf %48, %50 : vector<32x32xf32>
    %cst_33 = arith.constant 0.000000e+00 : f32
    %52 = vector.broadcast %cst_33 : f32 to vector<32x32xf32>
    %53 = arith.maximumf %51, %52 : vector<32x32xf32>
    %54 = arith.truncf %53 : vector<32x32xf32> to vector<32x32xbf16>
    %cst_34 = arith.constant 0.000000e+00 : bf16
    %55 = vector.broadcast %cst_34 : bf16 to vector<1x32xbf16>
    %56 = vector.extract_strided_slice %54 {offsets = [0, 0], sizes = [31, 32], strides = [1, 1]} : vector<32x32xbf16> to vector<31x32xbf16>
    %57 = tpu.concatenate %55, %56 in 0 : vector<1x32xbf16>, vector<31x32xbf16> -> vector<32x32xbf16>
    %58 = vector.extract_strided_slice %54 {offsets = [1, 0], sizes = [31, 32], strides = [1, 1]} : vector<32x32xbf16> to vector<31x32xbf16>
    %59 = tpu.concatenate %58, %55 in 0 : vector<31x32xbf16>, vector<1x32xbf16> -> vector<32x32xbf16>
    %60 = tpu.concatenate %57, %54, %59 in 1 : vector<32x32xbf16>, vector<32x32xbf16>, vector<32x32xbf16> -> vector<32x96xbf16>
    %c0_35 = arith.constant 0 : index
    %c0_36 = arith.constant 0 : index
    %61 = vector.load %arg11[%c0_35, %c0_36] : memref<96x10xbf16, #tpu.memory_space<vmem>>, vector<96x10xbf16>
    %cst_37 = arith.constant dense<0.000000e+00> : vector<32x10xf32>
    %62 = tpu.matmul %60, %61, %cst_37 {dimension_numbers = #tpu.dot_dimension_numbers<[1], [0], [0], [1], [0, 0, 1, 1], [], []>} : vector<32x96xbf16>, vector<96x10xbf16>, vector<32x10xf32> -> vector<32x10xf32>
    %c0_38 = arith.constant 0 : index
    %c0_39 = arith.constant 0 : index
    %63 = vector.load %arg12[%c0_38, %c0_39] : memref<1x10xf32, #tpu.memory_space<vmem>>, vector<1x10xf32>
    %64 = vector.broadcast %63 : vector<1x10xf32> to vector<32x10xf32>
    %65 = arith.addf %62, %64 : vector<32x10xf32>
    %c0_40 = arith.constant 0 : index
    %c0_41 = arith.constant 0 : index
    %c0_42 = arith.constant 0 : index
    %66 = vector.load %arg13[%c0_40, %c0_41, %c0_42] : memref<4x1x10xf32, #tpu.memory_space<vmem>>, vector<1x1x10xf32>
    %67 = vector.shape_cast %66 : vector<1x1x10xf32> to vector<1x10xf32>
    %68 = vector.broadcast %67 : vector<1x10xf32> to vector<32x10xf32>
    %69 = arith.mulf %65, %68 : vector<32x10xf32>
    %70 = math.exp %69 : vector<32x10xf32>
    %71 = vector.shape_cast %6 : vector<1x10xi1> to vector<1x10xi1>
    %72 = vector.broadcast %71 : vector<1x10xi1> to vector<32x10xi1>
    %73 = arith.select %72, %70, %65 : vector<32x10xi1>, vector<32x10xf32>
    %cst_43 = arith.constant 0.000000e+00 : bf16
    %74 = vector.broadcast %cst_43 : bf16 to vector<1x64xbf16>
    %75 = vector.extract_strided_slice %37 {offsets = [0, 0], sizes = [31, 64], strides = [1, 1]} : vector<32x64xbf16> to vector<31x64xbf16>
    %76 = tpu.concatenate %74, %75 in 0 : vector<1x64xbf16>, vector<31x64xbf16> -> vector<32x64xbf16>
    %77 = vector.extract_strided_slice %37 {offsets = [1, 0], sizes = [31, 64], strides = [1, 1]} : vector<32x64xbf16> to vector<31x64xbf16>
    %78 = tpu.concatenate %77, %74 in 0 : vector<31x64xbf16>, vector<1x64xbf16> -> vector<32x64xbf16>
    %79 = tpu.concatenate %76, %37, %78 in 1 : vector<32x64xbf16>, vector<32x64xbf16>, vector<32x64xbf16> -> vector<32x192xbf16>
    %c1 = arith.constant 1 : index
    %c0_44 = arith.constant 0 : index
    %c0_45 = arith.constant 0 : index
    %80 = vector.load %arg5[%c1, %c0_44, %c0_45] : memref<4x192x32xbf16, #tpu.memory_space<vmem>>, vector<1x192x32xbf16>
    %81 = vector.shape_cast %80 : vector<1x192x32xbf16> to vector<192x32xbf16>
    %cst_46 = arith.constant dense<0.000000e+00> : vector<32x32xf32>
    %82 = tpu.matmul %79, %81, %cst_46 {dimension_numbers = #tpu.dot_dimension_numbers<[1], [0], [0], [1], [0, 0, 1, 1], [], []>} : vector<32x192xbf16>, vector<192x32xbf16>, vector<32x32xf32> -> vector<32x32xf32>
    %c1_47 = arith.constant 1 : index
    %c0_48 = arith.constant 0 : index
    %c0_49 = arith.constant 0 : index
    %83 = vector.load %arg6[%c1_47, %c0_48, %c0_49] : memref<4x1x32xf32, #tpu.memory_space<vmem>>, vector<1x1x32xf32>
    %84 = vector.shape_cast %83 : vector<1x1x32xf32> to vector<1x32xf32>
    %85 = vector.broadcast %84 : vector<1x32xf32> to vector<32x32xf32>
    %86 = arith.addf %82, %85 : vector<32x32xf32>
    %cst_50 = arith.constant 0.000000e+00 : f32
    %87 = vector.broadcast %cst_50 : f32 to vector<32x32xf32>
    %88 = arith.maximumf %86, %87 : vector<32x32xf32>
    %c0_51 = arith.constant 0 : index
    %c0_52 = arith.constant 0 : index
    %89 = vector.load %arg3[%c0_51, %c0_52] : memref<32x64xbf16, #tpu.memory_space<vmem>>, vector<16x32xbf16>
    %90 = arith.truncf %88 : vector<32x32xf32> to vector<32x32xbf16>
    %cst_53 = arith.constant dense<0.000000e+00> : vector<16x32xf32>
    %91 = tpu.matmul %89, %90, %cst_53 {dimension_numbers = #tpu.dot_dimension_numbers<[1], [0], [0], [1], [0, 0, 1, 1], [], []>} : vector<16x32xbf16>, vector<32x32xbf16>, vector<16x32xf32> -> vector<16x32xf32>
    %92 = arith.truncf %91 : vector<16x32xf32> to vector<16x32xbf16>
    %c1_54 = arith.constant 1 : index
    %c0_55 = arith.constant 0 : index
    %c0_56 = arith.constant 0 : index
    %93 = vector.load %arg7[%c1_54, %c0_55, %c0_56] : memref<4x32x64xbf16, #tpu.memory_space<vmem>>, vector<1x32x64xbf16>
    %94 = vector.shape_cast %93 : vector<1x32x64xbf16> to vector<32x64xbf16>
    %cst_57 = arith.constant dense<0.000000e+00> : vector<16x64xf32>
    %95 = tpu.matmul %92, %94, %cst_57 {dimension_numbers = #tpu.dot_dimension_numbers<[1], [0], [0], [1], [0, 0, 1, 1], [], []>} : vector<16x32xbf16>, vector<32x64xbf16>, vector<16x64xf32> -> vector<16x64xf32>
    %c1_58 = arith.constant 1 : index
    %c0_59 = arith.constant 0 : index
    %c0_60 = arith.constant 0 : index
    %96 = vector.load %arg8[%c1_58, %c0_59, %c0_60] : memref<4x1x64xf32, #tpu.memory_space<vmem>>, vector<1x1x64xf32>
    %97 = vector.shape_cast %96 : vector<1x1x64xf32> to vector<1x64xf32>
    %98 = vector.broadcast %97 : vector<1x64xf32> to vector<16x64xf32>
    %99 = arith.addf %95, %98 : vector<16x64xf32>
    %cst_61 = arith.constant 0.000000e+00 : f32
    %100 = vector.broadcast %cst_61 : f32 to vector<16x64xf32>
    %101 = arith.maximumf %99, %100 : vector<16x64xf32>
    %102 = arith.truncf %101 : vector<16x64xf32> to vector<16x64xbf16>
    %103 = vector.extract_strided_slice %3 {offsets = [32, 0], sizes = [16, 64], strides = [1, 1]} : vector<64x64xf32> to vector<16x64xf32>
    %104 = arith.addf %101, %103 : vector<16x64xf32>
    %105 = arith.truncf %104 : vector<16x64xf32> to vector<16x64xbf16>
    %cst_62 = arith.constant 0.000000e+00 : bf16
    %106 = vector.broadcast %cst_62 : bf16 to vector<1x64xbf16>
    %107 = vector.extract_strided_slice %105 {offsets = [0, 0], sizes = [15, 64], strides = [1, 1]} : vector<16x64xbf16> to vector<15x64xbf16>
    %108 = tpu.concatenate %106, %107 in 0 : vector<1x64xbf16>, vector<15x64xbf16> -> vector<16x64xbf16>
    %109 = vector.extract_strided_slice %105 {offsets = [1, 0], sizes = [15, 64], strides = [1, 1]} : vector<16x64xbf16> to vector<15x64xbf16>
    %110 = tpu.concatenate %109, %106 in 0 : vector<15x64xbf16>, vector<1x64xbf16> -> vector<16x64xbf16>
    %111 = tpu.concatenate %108, %105, %110 in 1 : vector<16x64xbf16>, vector<16x64xbf16>, vector<16x64xbf16> -> vector<16x192xbf16>
    %c0_63 = arith.constant 0 : index
    %c0_64 = arith.constant 0 : index
    %112 = vector.load %arg9[%c0_63, %c0_64] : memref<192x32xbf16, #tpu.memory_space<vmem>>, vector<192x32xbf16>
    %cst_65 = arith.constant dense<0.000000e+00> : vector<16x32xf32>
    %113 = tpu.matmul %111, %112, %cst_65 {dimension_numbers = #tpu.dot_dimension_numbers<[1], [0], [0], [1], [0, 0, 1, 1], [], []>} : vector<16x192xbf16>, vector<192x32xbf16>, vector<16x32xf32> -> vector<16x32xf32>
    %c0_66 = arith.constant 0 : index
    %c0_67 = arith.constant 0 : index
    %114 = vector.load %arg10[%c0_66, %c0_67] : memref<1x32xf32, #tpu.memory_space<vmem>>, vector<1x32xf32>
    %115 = vector.broadcast %114 : vector<1x32xf32> to vector<16x32xf32>
    %116 = arith.addf %113, %115 : vector<16x32xf32>
    %cst_68 = arith.constant 0.000000e+00 : f32
    %117 = vector.broadcast %cst_68 : f32 to vector<16x32xf32>
    %118 = arith.maximumf %116, %117 : vector<16x32xf32>
    %119 = arith.truncf %118 : vector<16x32xf32> to vector<16x32xbf16>
    %cst_69 = arith.constant 0.000000e+00 : bf16
    %120 = vector.broadcast %cst_69 : bf16 to vector<1x32xbf16>
    %121 = vector.extract_strided_slice %119 {offsets = [0, 0], sizes = [15, 32], strides = [1, 1]} : vector<16x32xbf16> to vector<15x32xbf16>
    %122 = tpu.concatenate %120, %121 in 0 : vector<1x32xbf16>, vector<15x32xbf16> -> vector<16x32xbf16>
    %123 = vector.extract_strided_slice %119 {offsets = [1, 0], sizes = [15, 32], strides = [1, 1]} : vector<16x32xbf16> to vector<15x32xbf16>
    %124 = tpu.concatenate %123, %120 in 0 : vector<15x32xbf16>, vector<1x32xbf16> -> vector<16x32xbf16>
    %125 = tpu.concatenate %122, %119, %124 in 1 : vector<16x32xbf16>, vector<16x32xbf16>, vector<16x32xbf16> -> vector<16x96xbf16>
    %c0_70 = arith.constant 0 : index
    %c0_71 = arith.constant 0 : index
    %126 = vector.load %arg11[%c0_70, %c0_71] : memref<96x10xbf16, #tpu.memory_space<vmem>>, vector<96x10xbf16>
    %cst_72 = arith.constant dense<0.000000e+00> : vector<16x10xf32>
    %127 = tpu.matmul %125, %126, %cst_72 {dimension_numbers = #tpu.dot_dimension_numbers<[1], [0], [0], [1], [0, 0, 1, 1], [], []>} : vector<16x96xbf16>, vector<96x10xbf16>, vector<16x10xf32> -> vector<16x10xf32>
    %c0_73 = arith.constant 0 : index
    %c0_74 = arith.constant 0 : index
    %128 = vector.load %arg12[%c0_73, %c0_74] : memref<1x10xf32, #tpu.memory_space<vmem>>, vector<1x10xf32>
    %129 = vector.broadcast %128 : vector<1x10xf32> to vector<16x10xf32>
    %130 = arith.addf %127, %129 : vector<16x10xf32>
    %c1_75 = arith.constant 1 : index
    %c0_76 = arith.constant 0 : index
    %c0_77 = arith.constant 0 : index
    %131 = vector.load %arg13[%c1_75, %c0_76, %c0_77] : memref<4x1x10xf32, #tpu.memory_space<vmem>>, vector<1x1x10xf32>
    %132 = vector.shape_cast %131 : vector<1x1x10xf32> to vector<1x10xf32>
    %133 = vector.broadcast %132 : vector<1x10xf32> to vector<16x10xf32>
    %134 = arith.mulf %130, %133 : vector<16x10xf32>
    %135 = math.exp %134 : vector<16x10xf32>
    %136 = vector.shape_cast %6 : vector<1x10xi1> to vector<1x10xi1>
    %137 = vector.broadcast %136 : vector<1x10xi1> to vector<16x10xi1>
    %138 = arith.select %137, %135, %130 : vector<16x10xi1>, vector<16x10xf32>
    %cst_78 = arith.constant 0.000000e+00 : bf16
    %139 = vector.broadcast %cst_78 : bf16 to vector<1x64xbf16>
    %140 = vector.extract_strided_slice %102 {offsets = [0, 0], sizes = [15, 64], strides = [1, 1]} : vector<16x64xbf16> to vector<15x64xbf16>
    %141 = tpu.concatenate %139, %140 in 0 : vector<1x64xbf16>, vector<15x64xbf16> -> vector<16x64xbf16>
    %142 = vector.extract_strided_slice %102 {offsets = [1, 0], sizes = [15, 64], strides = [1, 1]} : vector<16x64xbf16> to vector<15x64xbf16>
    %143 = tpu.concatenate %142, %139 in 0 : vector<15x64xbf16>, vector<1x64xbf16> -> vector<16x64xbf16>
    %144 = tpu.concatenate %141, %102, %143 in 1 : vector<16x64xbf16>, vector<16x64xbf16>, vector<16x64xbf16> -> vector<16x192xbf16>
    %c2 = arith.constant 2 : index
    %c0_79 = arith.constant 0 : index
    %c0_80 = arith.constant 0 : index
    %145 = vector.load %arg5[%c2, %c0_79, %c0_80] : memref<4x192x32xbf16, #tpu.memory_space<vmem>>, vector<1x192x32xbf16>
    %146 = vector.shape_cast %145 : vector<1x192x32xbf16> to vector<192x32xbf16>
    %cst_81 = arith.constant dense<0.000000e+00> : vector<16x32xf32>
    %147 = tpu.matmul %144, %146, %cst_81 {dimension_numbers = #tpu.dot_dimension_numbers<[1], [0], [0], [1], [0, 0, 1, 1], [], []>} : vector<16x192xbf16>, vector<192x32xbf16>, vector<16x32xf32> -> vector<16x32xf32>
    %c2_82 = arith.constant 2 : index
    %c0_83 = arith.constant 0 : index
    %c0_84 = arith.constant 0 : index
    %148 = vector.load %arg6[%c2_82, %c0_83, %c0_84] : memref<4x1x32xf32, #tpu.memory_space<vmem>>, vector<1x1x32xf32>
    %149 = vector.shape_cast %148 : vector<1x1x32xf32> to vector<1x32xf32>
    %150 = vector.broadcast %149 : vector<1x32xf32> to vector<16x32xf32>
    %151 = arith.addf %147, %150 : vector<16x32xf32>
    %cst_85 = arith.constant 0.000000e+00 : f32
    %152 = vector.broadcast %cst_85 : f32 to vector<16x32xf32>
    %153 = arith.maximumf %151, %152 : vector<16x32xf32>
    %c0_86 = arith.constant 0 : index
    %c0_87 = arith.constant 0 : index
    %154 = vector.load %arg3[%c0_86, %c0_87] : memref<32x64xbf16, #tpu.memory_space<vmem>>, vector<8x16xbf16>
    %155 = arith.truncf %153 : vector<16x32xf32> to vector<16x32xbf16>
    %cst_88 = arith.constant dense<0.000000e+00> : vector<8x32xf32>
    %156 = tpu.matmul %154, %155, %cst_88 {dimension_numbers = #tpu.dot_dimension_numbers<[1], [0], [0], [1], [0, 0, 1, 1], [], []>} : vector<8x16xbf16>, vector<16x32xbf16>, vector<8x32xf32> -> vector<8x32xf32>
    %157 = arith.truncf %156 : vector<8x32xf32> to vector<8x32xbf16>
    %c2_89 = arith.constant 2 : index
    %c0_90 = arith.constant 0 : index
    %c0_91 = arith.constant 0 : index
    %158 = vector.load %arg7[%c2_89, %c0_90, %c0_91] : memref<4x32x64xbf16, #tpu.memory_space<vmem>>, vector<1x32x64xbf16>
    %159 = vector.shape_cast %158 : vector<1x32x64xbf16> to vector<32x64xbf16>
    %cst_92 = arith.constant dense<0.000000e+00> : vector<8x64xf32>
    %160 = tpu.matmul %157, %159, %cst_92 {dimension_numbers = #tpu.dot_dimension_numbers<[1], [0], [0], [1], [0, 0, 1, 1], [], []>} : vector<8x32xbf16>, vector<32x64xbf16>, vector<8x64xf32> -> vector<8x64xf32>
    %c2_93 = arith.constant 2 : index
    %c0_94 = arith.constant 0 : index
    %c0_95 = arith.constant 0 : index
    %161 = vector.load %arg8[%c2_93, %c0_94, %c0_95] : memref<4x1x64xf32, #tpu.memory_space<vmem>>, vector<1x1x64xf32>
    %162 = vector.shape_cast %161 : vector<1x1x64xf32> to vector<1x64xf32>
    %163 = vector.broadcast %162 : vector<1x64xf32> to vector<8x64xf32>
    %164 = arith.addf %160, %163 : vector<8x64xf32>
    %cst_96 = arith.constant 0.000000e+00 : f32
    %165 = vector.broadcast %cst_96 : f32 to vector<8x64xf32>
    %166 = arith.maximumf %164, %165 : vector<8x64xf32>
    %167 = arith.truncf %166 : vector<8x64xf32> to vector<8x64xbf16>
    %168 = vector.extract_strided_slice %3 {offsets = [48, 0], sizes = [8, 64], strides = [1, 1]} : vector<64x64xf32> to vector<8x64xf32>
    %169 = arith.addf %166, %168 : vector<8x64xf32>
    %170 = arith.truncf %169 : vector<8x64xf32> to vector<8x64xbf16>
    %cst_97 = arith.constant 0.000000e+00 : bf16
    %171 = vector.broadcast %cst_97 : bf16 to vector<1x64xbf16>
    %172 = vector.extract_strided_slice %170 {offsets = [0, 0], sizes = [7, 64], strides = [1, 1]} : vector<8x64xbf16> to vector<7x64xbf16>
    %173 = tpu.concatenate %171, %172 in 0 : vector<1x64xbf16>, vector<7x64xbf16> -> vector<8x64xbf16>
    %174 = vector.extract_strided_slice %170 {offsets = [1, 0], sizes = [7, 64], strides = [1, 1]} : vector<8x64xbf16> to vector<7x64xbf16>
    %175 = tpu.concatenate %174, %171 in 0 : vector<7x64xbf16>, vector<1x64xbf16> -> vector<8x64xbf16>
    %176 = tpu.concatenate %173, %170, %175 in 1 : vector<8x64xbf16>, vector<8x64xbf16>, vector<8x64xbf16> -> vector<8x192xbf16>
    %c0_98 = arith.constant 0 : index
    %c0_99 = arith.constant 0 : index
    %177 = vector.load %arg9[%c0_98, %c0_99] : memref<192x32xbf16, #tpu.memory_space<vmem>>, vector<192x32xbf16>
    %cst_100 = arith.constant dense<0.000000e+00> : vector<8x32xf32>
    %178 = tpu.matmul %176, %177, %cst_100 {dimension_numbers = #tpu.dot_dimension_numbers<[1], [0], [0], [1], [0, 0, 1, 1], [], []>} : vector<8x192xbf16>, vector<192x32xbf16>, vector<8x32xf32> -> vector<8x32xf32>
    %c0_101 = arith.constant 0 : index
    %c0_102 = arith.constant 0 : index
    %179 = vector.load %arg10[%c0_101, %c0_102] : memref<1x32xf32, #tpu.memory_space<vmem>>, vector<1x32xf32>
    %180 = vector.broadcast %179 : vector<1x32xf32> to vector<8x32xf32>
    %181 = arith.addf %178, %180 : vector<8x32xf32>
    %cst_103 = arith.constant 0.000000e+00 : f32
    %182 = vector.broadcast %cst_103 : f32 to vector<8x32xf32>
    %183 = arith.maximumf %181, %182 : vector<8x32xf32>
    %184 = arith.truncf %183 : vector<8x32xf32> to vector<8x32xbf16>
    %cst_104 = arith.constant 0.000000e+00 : bf16
    %185 = vector.broadcast %cst_104 : bf16 to vector<1x32xbf16>
    %186 = vector.extract_strided_slice %184 {offsets = [0, 0], sizes = [7, 32], strides = [1, 1]} : vector<8x32xbf16> to vector<7x32xbf16>
    %187 = tpu.concatenate %185, %186 in 0 : vector<1x32xbf16>, vector<7x32xbf16> -> vector<8x32xbf16>
    %188 = vector.extract_strided_slice %184 {offsets = [1, 0], sizes = [7, 32], strides = [1, 1]} : vector<8x32xbf16> to vector<7x32xbf16>
    %189 = tpu.concatenate %188, %185 in 0 : vector<7x32xbf16>, vector<1x32xbf16> -> vector<8x32xbf16>
    %190 = tpu.concatenate %187, %184, %189 in 1 : vector<8x32xbf16>, vector<8x32xbf16>, vector<8x32xbf16> -> vector<8x96xbf16>
    %c0_105 = arith.constant 0 : index
    %c0_106 = arith.constant 0 : index
    %191 = vector.load %arg11[%c0_105, %c0_106] : memref<96x10xbf16, #tpu.memory_space<vmem>>, vector<96x10xbf16>
    %cst_107 = arith.constant dense<0.000000e+00> : vector<8x10xf32>
    %192 = tpu.matmul %190, %191, %cst_107 {dimension_numbers = #tpu.dot_dimension_numbers<[1], [0], [0], [1], [0, 0, 1, 1], [], []>} : vector<8x96xbf16>, vector<96x10xbf16>, vector<8x10xf32> -> vector<8x10xf32>
    %c0_108 = arith.constant 0 : index
    %c0_109 = arith.constant 0 : index
    %193 = vector.load %arg12[%c0_108, %c0_109] : memref<1x10xf32, #tpu.memory_space<vmem>>, vector<1x10xf32>
    %194 = vector.broadcast %193 : vector<1x10xf32> to vector<8x10xf32>
    %195 = arith.addf %192, %194 : vector<8x10xf32>
    %c2_110 = arith.constant 2 : index
    %c0_111 = arith.constant 0 : index
    %c0_112 = arith.constant 0 : index
    %196 = vector.load %arg13[%c2_110, %c0_111, %c0_112] : memref<4x1x10xf32, #tpu.memory_space<vmem>>, vector<1x1x10xf32>
    %197 = vector.shape_cast %196 : vector<1x1x10xf32> to vector<1x10xf32>
    %198 = vector.broadcast %197 : vector<1x10xf32> to vector<8x10xf32>
    %199 = arith.mulf %195, %198 : vector<8x10xf32>
    %200 = math.exp %199 : vector<8x10xf32>
    %201 = vector.shape_cast %6 : vector<1x10xi1> to vector<1x10xi1>
    %202 = vector.broadcast %201 : vector<1x10xi1> to vector<8x10xi1>
    %203 = arith.select %202, %200, %195 : vector<8x10xi1>, vector<8x10xf32>
    %cst_113 = arith.constant 0.000000e+00 : bf16
    %204 = vector.broadcast %cst_113 : bf16 to vector<1x64xbf16>
    %205 = vector.extract_strided_slice %167 {offsets = [0, 0], sizes = [7, 64], strides = [1, 1]} : vector<8x64xbf16> to vector<7x64xbf16>
    %206 = tpu.concatenate %204, %205 in 0 : vector<1x64xbf16>, vector<7x64xbf16> -> vector<8x64xbf16>
    %207 = vector.extract_strided_slice %167 {offsets = [1, 0], sizes = [7, 64], strides = [1, 1]} : vector<8x64xbf16> to vector<7x64xbf16>
    %208 = tpu.concatenate %207, %204 in 0 : vector<7x64xbf16>, vector<1x64xbf16> -> vector<8x64xbf16>
    %209 = tpu.concatenate %206, %167, %208 in 1 : vector<8x64xbf16>, vector<8x64xbf16>, vector<8x64xbf16> -> vector<8x192xbf16>
    %c3 = arith.constant 3 : index
    %c0_114 = arith.constant 0 : index
    %c0_115 = arith.constant 0 : index
    %210 = vector.load %arg5[%c3, %c0_114, %c0_115] : memref<4x192x32xbf16, #tpu.memory_space<vmem>>, vector<1x192x32xbf16>
    %211 = vector.shape_cast %210 : vector<1x192x32xbf16> to vector<192x32xbf16>
    %cst_116 = arith.constant dense<0.000000e+00> : vector<8x32xf32>
    %212 = tpu.matmul %209, %211, %cst_116 {dimension_numbers = #tpu.dot_dimension_numbers<[1], [0], [0], [1], [0, 0, 1, 1], [], []>} : vector<8x192xbf16>, vector<192x32xbf16>, vector<8x32xf32> -> vector<8x32xf32>
    %c3_117 = arith.constant 3 : index
    %c0_118 = arith.constant 0 : index
    %c0_119 = arith.constant 0 : index
    %213 = vector.load %arg6[%c3_117, %c0_118, %c0_119] : memref<4x1x32xf32, #tpu.memory_space<vmem>>, vector<1x1x32xf32>
    %214 = vector.shape_cast %213 : vector<1x1x32xf32> to vector<1x32xf32>
    %215 = vector.broadcast %214 : vector<1x32xf32> to vector<8x32xf32>
    %216 = arith.addf %212, %215 : vector<8x32xf32>
    %cst_120 = arith.constant 0.000000e+00 : f32
    %217 = vector.broadcast %cst_120 : f32 to vector<8x32xf32>
    %218 = arith.maximumf %216, %217 : vector<8x32xf32>
    %c0_121 = arith.constant 0 : index
    %c0_122 = arith.constant 0 : index
    %219 = vector.load %arg3[%c0_121, %c0_122] : memref<32x64xbf16, #tpu.memory_space<vmem>>, vector<4x8xbf16>
    %220 = arith.truncf %218 : vector<8x32xf32> to vector<8x32xbf16>
    %cst_123 = arith.constant dense<0.000000e+00> : vector<4x32xf32>
    %221 = tpu.matmul %219, %220, %cst_123 {dimension_numbers = #tpu.dot_dimension_numbers<[1], [0], [0], [1], [0, 0, 1, 1], [], []>} : vector<4x8xbf16>, vector<8x32xbf16>, vector<4x32xf32> -> vector<4x32xf32>
    %222 = arith.truncf %221 : vector<4x32xf32> to vector<4x32xbf16>
    %c3_124 = arith.constant 3 : index
    %c0_125 = arith.constant 0 : index
    %c0_126 = arith.constant 0 : index
    %223 = vector.load %arg7[%c3_124, %c0_125, %c0_126] : memref<4x32x64xbf16, #tpu.memory_space<vmem>>, vector<1x32x64xbf16>
    %224 = vector.shape_cast %223 : vector<1x32x64xbf16> to vector<32x64xbf16>
    %cst_127 = arith.constant dense<0.000000e+00> : vector<4x64xf32>
    %225 = tpu.matmul %222, %224, %cst_127 {dimension_numbers = #tpu.dot_dimension_numbers<[1], [0], [0], [1], [0, 0, 1, 1], [], []>} : vector<4x32xbf16>, vector<32x64xbf16>, vector<4x64xf32> -> vector<4x64xf32>
    %c3_128 = arith.constant 3 : index
    %c0_129 = arith.constant 0 : index
    %c0_130 = arith.constant 0 : index
    %226 = vector.load %arg8[%c3_128, %c0_129, %c0_130] : memref<4x1x64xf32, #tpu.memory_space<vmem>>, vector<1x1x64xf32>
    %227 = vector.shape_cast %226 : vector<1x1x64xf32> to vector<1x64xf32>
    %228 = vector.broadcast %227 : vector<1x64xf32> to vector<4x64xf32>
    %229 = arith.addf %225, %228 : vector<4x64xf32>
    %cst_131 = arith.constant 0.000000e+00 : f32
    %230 = vector.broadcast %cst_131 : f32 to vector<4x64xf32>
    %231 = arith.maximumf %229, %230 : vector<4x64xf32>
    %232 = vector.extract_strided_slice %3 {offsets = [56, 0], sizes = [4, 64], strides = [1, 1]} : vector<64x64xf32> to vector<4x64xf32>
    %233 = arith.addf %231, %232 : vector<4x64xf32>
    %234 = arith.truncf %233 : vector<4x64xf32> to vector<4x64xbf16>
    %cst_132 = arith.constant 0.000000e+00 : bf16
    %235 = vector.broadcast %cst_132 : bf16 to vector<1x64xbf16>
    %236 = vector.extract_strided_slice %234 {offsets = [0, 0], sizes = [3, 64], strides = [1, 1]} : vector<4x64xbf16> to vector<3x64xbf16>
    %237 = tpu.concatenate %235, %236 in 0 : vector<1x64xbf16>, vector<3x64xbf16> -> vector<4x64xbf16>
    %238 = vector.extract_strided_slice %234 {offsets = [1, 0], sizes = [3, 64], strides = [1, 1]} : vector<4x64xbf16> to vector<3x64xbf16>
    %239 = tpu.concatenate %238, %235 in 0 : vector<3x64xbf16>, vector<1x64xbf16> -> vector<4x64xbf16>
    %240 = tpu.concatenate %237, %234, %239 in 1 : vector<4x64xbf16>, vector<4x64xbf16>, vector<4x64xbf16> -> vector<4x192xbf16>
    %c0_133 = arith.constant 0 : index
    %c0_134 = arith.constant 0 : index
    %241 = vector.load %arg9[%c0_133, %c0_134] : memref<192x32xbf16, #tpu.memory_space<vmem>>, vector<192x32xbf16>
    %cst_135 = arith.constant dense<0.000000e+00> : vector<4x32xf32>
    %242 = tpu.matmul %240, %241, %cst_135 {dimension_numbers = #tpu.dot_dimension_numbers<[1], [0], [0], [1], [0, 0, 1, 1], [], []>} : vector<4x192xbf16>, vector<192x32xbf16>, vector<4x32xf32> -> vector<4x32xf32>
    %c0_136 = arith.constant 0 : index
    %c0_137 = arith.constant 0 : index
    %243 = vector.load %arg10[%c0_136, %c0_137] : memref<1x32xf32, #tpu.memory_space<vmem>>, vector<1x32xf32>
    %244 = vector.broadcast %243 : vector<1x32xf32> to vector<4x32xf32>
    %245 = arith.addf %242, %244 : vector<4x32xf32>
    %cst_138 = arith.constant 0.000000e+00 : f32
    %246 = vector.broadcast %cst_138 : f32 to vector<4x32xf32>
    %247 = arith.maximumf %245, %246 : vector<4x32xf32>
    %248 = arith.truncf %247 : vector<4x32xf32> to vector<4x32xbf16>
    %cst_139 = arith.constant 0.000000e+00 : bf16
    %249 = vector.broadcast %cst_139 : bf16 to vector<1x32xbf16>
    %250 = vector.extract_strided_slice %248 {offsets = [0, 0], sizes = [3, 32], strides = [1, 1]} : vector<4x32xbf16> to vector<3x32xbf16>
    %251 = tpu.concatenate %249, %250 in 0 : vector<1x32xbf16>, vector<3x32xbf16> -> vector<4x32xbf16>
    %252 = vector.extract_strided_slice %248 {offsets = [1, 0], sizes = [3, 32], strides = [1, 1]} : vector<4x32xbf16> to vector<3x32xbf16>
    %253 = tpu.concatenate %252, %249 in 0 : vector<3x32xbf16>, vector<1x32xbf16> -> vector<4x32xbf16>
    %254 = tpu.concatenate %251, %248, %253 in 1 : vector<4x32xbf16>, vector<4x32xbf16>, vector<4x32xbf16> -> vector<4x96xbf16>
    %c0_140 = arith.constant 0 : index
    %c0_141 = arith.constant 0 : index
    %255 = vector.load %arg11[%c0_140, %c0_141] : memref<96x10xbf16, #tpu.memory_space<vmem>>, vector<96x10xbf16>
    %cst_142 = arith.constant dense<0.000000e+00> : vector<4x10xf32>
    %256 = tpu.matmul %254, %255, %cst_142 {dimension_numbers = #tpu.dot_dimension_numbers<[1], [0], [0], [1], [0, 0, 1, 1], [], []>} : vector<4x96xbf16>, vector<96x10xbf16>, vector<4x10xf32> -> vector<4x10xf32>
    %c0_143 = arith.constant 0 : index
    %c0_144 = arith.constant 0 : index
    %257 = vector.load %arg12[%c0_143, %c0_144] : memref<1x10xf32, #tpu.memory_space<vmem>>, vector<1x10xf32>
    %258 = vector.broadcast %257 : vector<1x10xf32> to vector<4x10xf32>
    %259 = arith.addf %256, %258 : vector<4x10xf32>
    %c3_145 = arith.constant 3 : index
    %c0_146 = arith.constant 0 : index
    %c0_147 = arith.constant 0 : index
    %260 = vector.load %arg13[%c3_145, %c0_146, %c0_147] : memref<4x1x10xf32, #tpu.memory_space<vmem>>, vector<1x1x10xf32>
    %261 = vector.shape_cast %260 : vector<1x1x10xf32> to vector<1x10xf32>
    %262 = vector.broadcast %261 : vector<1x10xf32> to vector<4x10xf32>
    %263 = arith.mulf %259, %262 : vector<4x10xf32>
    %264 = math.exp %263 : vector<4x10xf32>
    %265 = vector.shape_cast %6 : vector<1x10xi1> to vector<1x10xi1>
    %266 = vector.broadcast %265 : vector<1x10xi1> to vector<4x10xi1>
    %267 = arith.select %266, %264, %259 : vector<4x10xi1>, vector<4x10xf32>
    %268 = tpu.concatenate %73, %138, %203, %267 in 0 : vector<32x10xf32>, vector<16x10xf32>, vector<8x10xf32>, vector<4x10xf32> -> vector<60x10xf32>
    %cst_148 = arith.constant 0.000000e+00 : f32
    %269 = vector.broadcast %cst_148 : f32 to vector<4x10xf32>
    %270 = tpu.concatenate %268, %269 in 0 : vector<60x10xf32>, vector<4x10xf32> -> vector<64x10xf32>
    %c0_149 = arith.constant 0 : index
    %c0_150 = arith.constant 0 : index
    %c0_151 = arith.constant 0 : index
    %271 = vector.load %arg14[%c0_149, %c0_150, %c0_151] : memref<1x64x10xf32, #tpu.memory_space<vmem>>, vector<1x64x10xf32>
    %272 = vector.shape_cast %271 : vector<1x64x10xf32> to vector<64x10xf32>
    %273 = vector.shape_cast %270 : vector<64x10xf32> to vector<1x64x10xf32>
    tpu.vector_store %arg14[%c0_149, %c0_150, %c0_151], %273 {strides = array<i32>} : memref<1x64x10xf32, #tpu.memory_space<vmem>>, vector<1x64x10xf32>,
    return
  }
  func.func @transform_0(%arg0: i32) -> (i32, i32, i32) {
    %c0_i32 = arith.constant 0 : i32
    %c0_i32_0 = arith.constant 0 : i32
    %c0_i32_1 = arith.constant 0 : i32
    return %arg0, %c0_i32, %c0_i32_0 : i32, i32, i32
  }
  func.func @transform_1(%arg0: i32) -> (i32, i32, i32) {
    %c0_i32 = arith.constant 0 : i32
    %c0_i32_0 = arith.constant 0 : i32
    %c0_i32_1 = arith.constant 0 : i32
    return %arg0, %c0_i32, %c0_i32_0 : i32, i32, i32
  }
  func.func @transform_2(%arg0: i32) -> (i32, i32) {
    %c0_i32 = arith.constant 0 : i32
    %c0_i32_0 = arith.constant 0 : i32
    %c0_i32_1 = arith.constant 0 : i32
    return %c0_i32, %c0_i32_0 : i32, i32
  }
  func.func @transform_3(%arg0: i32) -> (i32, i32) {
    %c0_i32 = arith.constant 0 : i32
    %c0_i32_0 = arith.constant 0 : i32
    %c0_i32_1 = arith.constant 0 : i32
    return %c0_i32, %c0_i32_0 : i32, i32
  }
  func.func @transform_4(%arg0: i32) -> (i32, i32, i32) {
    %c0_i32 = arith.constant 0 : i32
    %c0_i32_0 = arith.constant 0 : i32
    %c0_i32_1 = arith.constant 0 : i32
    %c0_i32_2 = arith.constant 0 : i32
    return %c0_i32, %c0_i32_0, %c0_i32_1 : i32, i32, i32
  }
  func.func @transform_5(%arg0: i32) -> (i32, i32, i32) {
    %c0_i32 = arith.constant 0 : i32
    %c0_i32_0 = arith.constant 0 : i32
    %c0_i32_1 = arith.constant 0 : i32
    %c0_i32_2 = arith.constant 0 : i32
    return %c0_i32, %c0_i32_0, %c0_i32_1 : i32, i32, i32
  }
  func.func @transform_6(%arg0: i32) -> (i32, i32, i32) {
    %c0_i32 = arith.constant 0 : i32
    %c0_i32_0 = arith.constant 0 : i32
    %c0_i32_1 = arith.constant 0 : i32
    %c0_i32_2 = arith.constant 0 : i32
    return %c0_i32, %c0_i32_0, %c0_i32_1 : i32, i32, i32
  }
  func.func @transform_7(%arg0: i32) -> (i32, i32, i32) {
    %c0_i32 = arith.constant 0 : i32
    %c0_i32_0 = arith.constant 0 : i32
    %c0_i32_1 = arith.constant 0 : i32
    %c0_i32_2 = arith.constant 0 : i32
    return %c0_i32, %c0_i32_0, %c0_i32_1 : i32, i32, i32
  }
  func.func @transform_8(%arg0: i32) -> (i32, i32) {
    %c0_i32 = arith.constant 0 : i32
    %c0_i32_0 = arith.constant 0 : i32
    %c0_i32_1 = arith.constant 0 : i32
    return %c0_i32, %c0_i32_0 : i32, i32
  }
  func.func @transform_9(%arg0: i32) -> (i32, i32) {
    %c0_i32 = arith.constant 0 : i32
    %c0_i32_0 = arith.constant 0 : i32
    %c0_i32_1 = arith.constant 0 : i32
    return %c0_i32, %c0_i32_0 : i32, i32
  }
  func.func @transform_10(%arg0: i32) -> (i32, i32) {
    %c0_i32 = arith.constant 0 : i32
    %c0_i32_0 = arith.constant 0 : i32
    %c0_i32_1 = arith.constant 0 : i32
    return %c0_i32, %c0_i32_0 : i32, i32
  }
  func.func @transform_11(%arg0: i32) -> (i32, i32) {
    %c0_i32 = arith.constant 0 : i32
    %c0_i32_0 = arith.constant 0 : i32
    %c0_i32_1 = arith.constant 0 : i32
    return %c0_i32, %c0_i32_0 : i32, i32
  }
  func.func @transform_12(%arg0: i32) -> (i32, i32, i32) {
    %c0_i32 = arith.constant 0 : i32
    %c0_i32_0 = arith.constant 0 : i32
    %c0_i32_1 = arith.constant 0 : i32
    %c0_i32_2 = arith.constant 0 : i32
    return %c0_i32, %c0_i32_0, %c0_i32_1 : i32, i32, i32
  }
  func.func @transform_13(%arg0: i32) -> (i32, i32, i32) {
    %c0_i32 = arith.constant 0 : i32
    %c0_i32_0 = arith.constant 0 : i32
    %c0_i32_1 = arith.constant 0 : i32
    return %arg0, %c0_i32, %c0_i32_0 : i32, i32, i32
  }
}

</mosaic_0001>

<bundles_post_ra>
// kernel: pyramid_detection_forward.1
= control target key start
LH: loop header
LB: loop body
LE: loop exit
PB: predicated region body
PF: predicated region fallthrough
CT: control target
= control target key end

     0   :  { %s3693_s25 = smov 0   ;;  %s4555_s0 = inlined_call_operand.vmem [shape: bf16[2,64,64], index: 0, kind: input, shape index: {}]   ;;  %s4556_s1 = inlined_call_operand.vmem [shape: bf16[2,512,64], index: 1, kind: input, shape index: {}]   ;;  %s4557_s2 = inlined_call_operand.vmem [shape: bf16[32,64], index: 2, kind: input, shape index: {}]   ;;  %s4558_s3 = inlined_call_operand.vmem [shape: bf16[64,512], index: 3, kind: input, shape index: {}]   ;;  %s4559_s4 = inlined_call_operand.vmem [shape: bf16[4,192,32], index: 4, kind: input, shape index: {}]   ;;  %s4560_s5 = inlined_call_operand.vmem [shape: f32[4,1,32], index: 5, kind: input, shape index: {}]   ;;  %s4561_s6 = inlined_call_operand.vmem [shape: bf16[4,32,64], index: 6, kind: input, shape index: {}]   ;;  %s4562_s7 = inlined_call_operand.vmem [shape: f32[4,1,64], index: 7, kind: input, shape index: {}]   ;;  %s4563_s8 = inlined_call_operand.vmem [shape: bf16[192,32], index: 8, kind: input, shape index: {}]   ;;  %s4564_s9 = inlined_call_operand.vmem [shape: f32[1,32], index: 9, kind: input, shape index: {}]   ;;  %s4565_s10 = inlined_call_operand.vmem [shape: bf16[96,10], index: 10, kind: input, shape index: {}]   ;;  %s4566_s11 = inlined_call_operand.vmem [shape: f32[1,10], index: 11, kind: input, shape index: {}]   ;;  %s4567_s12 = inlined_call_operand.vmem [shape: f32[4,1,10], index: 12, kind: input, shape index: {}]   ;;  %s4568_s13 = inlined_call_operand.vmem [shape: f32[2,64,10], index: 13, kind: output, shape index: {}]  }
   0x1 LB: > { %s2787_s26 = sadd.s32 4294967295, %s3619_s25   ;;  %p2791_p0 = scmp.ge.s32.totalorder %s3619_s25, 1  ;;  %s3619_s25 = sphi %s3693_s25, %s23_s25  }
   0x2   : > { %p397_p1 = scmp.lt.s32.totalorder %s3619_s25, 3 }
   0x4   : > { %p398_p2 = pnand %p2791_p0, %p397_p1 }
   0x5   : > { %p446_p3 = scmp.lt.s32.totalorder (!%p398_p2), %s2787_s26, 1  ;;  %s3621_s18 = smov (!%p398_p2), 64  }
   0x6   : > { %401 = sbr.rel (%p398_p2) target bundleno = 2930 (0xb72), region = 72 }
   0xb   : > { %s4578_s26 = smov (!%p446_p3, %s2787_s26), 1  ;;  %v2808_v33 = vld [vmem:[%s4558_s3 + $0x8] sm:$0xf]  ;;  %v3443_v34 = vld [vmem:[%s4558_s3 + $0x14] sm:$0xf0]  ;;  %v3498_v61 = vld [vmem:[%s4559_s4 + $0x30] sm:$0xff] }
   0xc   : > { %s3437_s27 = sshll.u32 %s4578_s26, 5  ;;  %s3438_s28 = sshll.u32 %s4578_s26, 8  ;;  %v3441_v37 = vld [vmem:[%s4558_s3 + $0xc] sm:$0xf]  ;;  %v2810_v38 = vld [vmem:[%s4558_s3 + $0x18] sm:$0xf0]  ;;  %v2809_v44 = vor.u32 %v3443_v34, %v2808_v33 }
   0xd   : > { %s3708_s14 = scalar_lea.vmem %s4555_s0, %s3437_s27  ;;  %s3713_s17 = scalar_lea.vmem %s4556_s1, %s3438_s28  ;;  %v2800_v39 = vld [vmem:[%s4558_s3] sm:$0xf]  ;;  %v3442_v40 = vld [vmem:[%s4558_s3 + $0xc] sm:$0xf0]  ;;  %v3440_v42 = vld [vmem:[%s4558_s3 + $0x4] sm:$0xf]  ;;  %v2813_v45 = vor.u32 %v3441_v37, %v2810_v38 }
   0xe   : > { %v3716_v0 = vld [vmem:[%s3708_s14] sm:$0xff]  ;;  %v3479_v1 = vld [vmem:[%s3713_s17 + $0xb8] sm:$0xff]  ;;  %v3478_v5 = vld [vmem:[%s3713_s17 + $0xb0] sm:$0xff]  ;;  %v2801_v46 = vor.u32 %v3442_v40, %v2800_v39  ;;  %vm997_vm0 = vsmask.f32 7424  ;;  %vm1021_vm1 = vcmask 523264  }
   0xf   : > { %v3487_v2 = vld [vmem:[%s3713_s17 + $0xf8] sm:$0xff]  ;;  %1013 = vrot.lane.b32.xlu0 %v3716_v0, %s3621_s18  ;;  %872 = vmatpush.bf16.msra.mxu2 %v3479_v1  ;;  %v3486_v6 = vld [vmem:[%s3713_s17 + $0xf0] sm:$0xff]  ;;  %v3729_v9 = vld [vmem:[%s3708_s14 + $0x8] sm:$0xff]  ;;  %v963_v37 = vshrl.u32 %v3716_v0, 16  ;;  %vm961_vm2 = vsmask.f32 256 }
  0x10   : > { %v3463_v3 = vld [vmem:[%s3713_s17 + $0x38] sm:$0xff]  ;;  %901 = vmatpush.bf16.msra.mxu3 %v3487_v2  ;;  %v3462_v7 = vld [vmem:[%s3713_s17 + $0x30] sm:$0xff]  ;;  %v3477_v10 = vld [vmem:[%s3713_s17 + $0xa8] sm:$0xff]  ;;  %v973_v38 = vshll.u32 %v3729_v9, 16  ;;  %vm994_vm3 = vcmask 1040384   ;;  %vm1010_vm5 = vcmask 1047552  }
  0x11   : > { %v3471_v4 = vld [vmem:[%s3713_s17 + $0x78] sm:$0xff]  ;;  %814 = vmatpush.bf16.msra.mxu0 %v3463_v3  ;;  %v3470_v8 = vld [vmem:[%s3713_s17 + $0x70] sm:$0xff]  ;;  %v3485_v11 = vld [vmem:[%s3713_s17 + $0xe8] sm:$0xff]  ;;  %vm1281_vm7 = vcmask 261120   ;;  %vm1626_vm8 = vcmask 785408   ;;  %s3439_s29 = sshll.u32 %s4578_s26, 6 }
  0x12   : > { %843 = vmatpush.bf16.msra.mxu1 %v3471_v4  ;;  %v3461_v12 = vld [vmem:[%s3713_s17 + $0x28] sm:$0xff]  ;;  %v3736_v14 = vld [vmem:[%s3708_s14 + $0x10] sm:$0xff]  ;;  %v3476_v15 = vld [vmem:[%s3713_s17 + $0xa0] sm:$0xff]  ;;  %s4269_s16 = scalar_lea.vmem %s4568_s13, %s3439_s29  ;;  %vm2711_vm10 = vcmask 80896   ;;  %vm2219_vm11 = vcmask 130048   ;;  %vm2294_vm12 = vcmask 1043456  }
  0x13   : > { %873 = vmatpush.bf16.msra.mxu2 %v3478_v5  ;;  %v3469_v13 = vld [vmem:[%s3713_s17 + $0x68] sm:$0xff]  ;;  %v3484_v16 = vld [vmem:[%s3713_s17 + $0xe0] sm:$0xff]  ;;  %1017 = vrot.lane.b32.xlu1 %v3736_v14, %s3621_s18  ;;  %v3475_v19 = vld [vmem:[%s3713_s17 + $0x98] sm:$0xff]  ;;  %vm2295_vm13 = vsmask.f32 3328  ;;  %vm2541_vm15 = vcmask 64512  }
  0x14   : > { %902 = vmatpush.bf16.msra.mxu3 %v3486_v6  ;;  %v3460_v17 = vld [vmem:[%s3713_s17 + $0x20] sm:$0xff]  ;;  %v3483_v20 = vld [vmem:[%s3713_s17 + $0xd8] sm:$0xff]  ;;  %v3474_v24 = vld [vmem:[%s3713_s17 + $0x90] sm:$0xff] }
  0x15   : > { %815 = vmatpush.bf16.msra.mxu0 %v3462_v7  ;;  %v3468_v18 = vld [vmem:[%s3713_s17 + $0x60] sm:$0xff]  ;;  %v3459_v21 = vld [vmem:[%s3713_s17 + $0x18] sm:$0xff]  ;;  %v3482_v25 = vld [vmem:[%s3713_s17 + $0xd0] sm:$0xff] }
  0x16   : > { %844 = vmatpush.bf16.msra.mxu1 %v3470_v8  ;;  %v3467_v22 = vld [vmem:[%s3713_s17 + $0x58] sm:$0xff]  ;;  %v3458_v26 = vld [vmem:[%s3713_s17 + $0x10] sm:$0xff]  ;;  %v3473_v28 = vld [vmem:[%s3713_s17 + $0x88] sm:$0xff] }
  0x17   : > { %1015 = vrot.lane.b32.xlu0 %v3729_v9, %s3621_s18  ;;  %874 = vmatpush.bf16.msra.mxu2 %v3477_v10  ;;  %v3751_v23 = vld [vmem:[%s3708_s14 + $0x18] sm:$0xff]  ;;  %v3466_v27 = vld [vmem:[%s3713_s17 + $0x50] sm:$0xff]  ;;  %v3481_v29 = vld [vmem:[%s3713_s17 + $0xc8] sm:$0xff]  ;;  %s3622_s14 = smov 32  }
  0x18   : > { %903 = vmatpush.bf16.msra.mxu3 %v3485_v11  ;;  %v3457_v30 = vld [vmem:[%s3713_s17 + $0x8] sm:$0xff]  ;;  %v3472_v32 = vld [vmem:[%s3713_s17 + $0x80] sm:$0xff]  ;;  %v2802_v43 = vld [vmem:[%s4558_s3 + $0x10] sm:$0xf0] }
  0x19   : > { %816 = vmatpush.bf16.msra.mxu0 %v3461_v12  ;;  %v3465_v31 = vld [vmem:[%s3713_s17 + $0x48] sm:$0xff]  ;;  %v3480_v35 = vld [vmem:[%s3713_s17 + $0xc0] sm:$0xff]  ;;  %v2805_v47 = vor.u32 %v3440_v42, %v2802_v43  ;;  %v3499_v48 = vld [vmem:[%s4559_s4 + $0x38] sm:$0xff]  ;;  %v970_v43 = vshrl.u32 %v3729_v9, 16 }
  0x1a   : > { %845 = vmatpush.bf16.msra.mxu1 %v3469_v13  ;;  %v3456_v36 = vld [vmem:[%s3713_s17] sm:$0xff]  ;;  %v2824_v49 = vld [vmem:[%s4558_s3 + $0x28] sm:$0xf]  ;;  %v3447_v50 = vld [vmem:[%s4558_s3 + $0x34] sm:$0xf0] }
  0x1b   : > { %875 = vmatpush.bf16.msra.mxu2 %v3476_v15  ;;  %1019 = vrot.lane.b32.xlu1 %v3751_v23, %s3621_s18  ;;  %v3464_v41 = vld [vmem:[%s3713_s17 + $0x40] sm:$0xff]  ;;  %v3445_v51 = vld [vmem:[%s4558_s3 + $0x2c] sm:$0xf]  ;;  %v2826_v52 = vld [vmem:[%s4558_s3 + $0x38] sm:$0xf0]  ;;  %v2825_v57 = vor.u32 %v3447_v50, %v2824_v49 }
  0x1c   : > { %904 = vmatpush.bf16.msra.mxu3 %v3484_v16  ;;  %v2816_v53 = vld [vmem:[%s4558_s3 + $0x20] sm:$0xf]  ;;  %v3446_v54 = vld [vmem:[%s4558_s3 + $0x2c] sm:$0xf0]  ;;  %v3444_v55 = vld [vmem:[%s4558_s3 + $0x24] sm:$0xf]  ;;  %v2829_v58 = vor.u32 %v3445_v51, %v2826_v52 }
  0x1d   : > { %817 = vmatpush.bf16.msra.mxu0 %v3460_v17  ;;  %v2818_v56 = vld [vmem:[%s4558_s3 + $0x30] sm:$0xf0]  ;;  %v2817_v59 = vor.u32 %v3446_v54, %v2816_v53  ;;  %v3497_v62 = vld [vmem:[%s4559_s4 + $0x28] sm:$0xff]  ;;  %v3503_v63 = vld [vmem:[%s4559_s4 + $0x58] sm:$0xff]  ;;  %v972_v52 = vrot.slane %v970_v43, 7  ;;  %v978_v53 = vshrl.u32 %v3736_v14, 16 }
  0x1e   : > { %846 = vmatpush.bf16.msra.mxu1 %v3468_v18  ;;  %v2821_v60 = vor.u32 %v3444_v55, %v2818_v56  ;;  %v3502_v1 = vld [vmem:[%s4559_s4 + $0x50] sm:$0xff]  ;;  %v3496_v2 = vld [vmem:[%s4559_s4 + $0x20] sm:$0xff]  ;;  %v2840_v3 = vld [vmem:[%s4558_s3 + $0x48] sm:$0xf]  ;;  %v989_v54 = vshll.u32 %v3751_v23, 16 }
  0x1f   : > { %876 = vmatpush.bf16.msra.mxu2 %v3475_v19  ;;  %v3501_v4 = vld [vmem:[%s4559_s4 + $0x48] sm:$0xff]  ;;  %v3451_v5 = vld [vmem:[%s4558_s3 + $0x54] sm:$0xf0]  ;;  %v2842_v7 = vld [vmem:[%s4558_s3 + $0x58] sm:$0xf0]  ;;  %v975_v55 = vor.u32 %v973_v38, %v972_v52 }
  0x20   : > { %905 = vmatpush.bf16.msra.mxu3 %v3483_v20  ;;  %v3449_v6 = vld [vmem:[%s4558_s3 + $0x4c] sm:$0xf]  ;;  %v2832_v8 = vld [vmem:[%s4558_s3 + $0x40] sm:$0xf]  ;;  %v3450_v10 = vld [vmem:[%s4558_s3 + $0x4c] sm:$0xf0]  ;;  %v2841_v15 = vor.u32 %v3451_v5, %v2840_v3 }
  0x21   : > { %818 = vmatpush.bf16.msra.mxu0 %v3459_v21  ;;  %v3495_v11 = vld [vmem:[%s4559_s4 + $0x18] sm:$0xff]  ;;  %v3448_v12 = vld [vmem:[%s4558_s3 + $0x44] sm:$0xf]  ;;  %v2834_v13 = vld [vmem:[%s4558_s3 + $0x50] sm:$0xf0]  ;;  %v2845_v17 = vor.u32 %v3449_v6, %v2842_v7  ;;  %v2833_v18 = vor.u32 %v3450_v10, %v2832_v8 }
  0x22   : > { %847 = vmatpush.bf16.msra.mxu1 %v3467_v22  ;;  %v3500_v16 = vld [vmem:[%s4559_s4 + $0x40] sm:$0xff]  ;;  %v2837_v19 = vor.u32 %v3448_v12, %v2834_v13  ;;  %v3494_v20 = vld [vmem:[%s4559_s4 + $0x10] sm:$0xff]  ;;  %v3493_v21 = vld [vmem:[%s4559_s4 + $0x8] sm:$0xff] }
  0x23   : > { %877 = vmatpush.bf16.msra.mxu2 %v3474_v24  ;;  %v3492_v22 = vld [vmem:[%s4559_s4] sm:$0xff]  ;;  %v2856_v24 = vld [vmem:[%s4558_s3 + $0x68] sm:$0xf]  ;;  %vm3907_vm4 = vmand %vm994_vm3, %vm961_vm2 }
  0x24   : > { %906 = vmatpush.bf16.msra.mxu3 %v3482_v25  ;;  %v3455_v25 = vld [vmem:[%s4558_s3 + $0x74] sm:$0xf0]  ;;  %vm3924_vm6 = vmand %vm1010_vm5, %vm997_vm0 }
  0x25   : > { %819 = vmatpush.bf16.msra.mxu0 %v3458_v26  ;;  %v3453_v26 = vld [vmem:[%s4558_s3 + $0x6c] sm:$0xf]  ;;  %vm4430_vm14 = vmand %vm2294_vm12, %vm2295_vm13 }
  0x26   : > { %848 = vmatpush.bf16.msra.mxu1 %v3466_v27  ;;  %v2858_v27 = vld [vmem:[%s4558_s3 + $0x78] sm:$0xf0] }
  0x27   : > { %878 = vmatpush.bf16.msra.mxu2 %v3473_v28  ;;  %v2848_v28 = vld [vmem:[%s4558_s3 + $0x60] sm:$0xf]  ;;  %v2861_v33 = vor.u32 %v3453_v26, %v2858_v27 }
  0x28   : > { %907 = vmatpush.bf16.msra.mxu3 %v3481_v29  ;;  %v3454_v29 = vld [vmem:[%s4558_s3 + $0x6c] sm:$0xf0] }
  0x29   : > { %820 = vmatpush.bf16.msra.mxu0 %v3457_v30  ;;  %v3452_v30 = vld [vmem:[%s4558_s3 + $0x64] sm:$0xf]  ;;  %v2849_v34 = vor.u32 %v3454_v29, %v2848_v28 }
  0x2a   : > { %849 = vmatpush.bf16.msra.mxu1 %v3465_v31  ;;  %v2850_v31 = vld [vmem:[%s4558_s3 + $0x70] sm:$0xf0] }
  0x2b   : > { %879 = vmatpush.bf16.msra.mxu2 %v3472_v32  ;;  %v2857_v32 = vor.u32 %v3455_v25, %v2856_v24 }
  0x2c   : > { %908 = vmatpush.bf16.msra.mxu3 %v3480_v35  ;;  %v2853_v35 = vor.u32 %v3452_v30, %v2850_v31 }
  0x2d   : > { %821 = vmatpush.bf16.msra.mxu0 %v3456_v36  ;;  %v966_v36 = vshll.u32 %v3716_v0, 16 }
  0x2e   : > { %850 = vmatpush.bf16.msra.mxu1 %v3464_v41  ;;  %880 = vmatmul.bf16.vlgmr.msra.gmra.mxu2 %v2809_v44  ;;  %v1000_v41 = vrot.slane %v973_v38, 1  ;;  %v981_v44 = vshll.u32 %v3736_v14, 16 }
  0x2f   : > { %909 = vmatmul.bf16.vlgmr.msra.gmra.mxu3 %v2813_v45  ;;  %v998_v39 = vrot.slane %v966_v36, 1  ;;  %v965_v45 = vrot.slane %v963_v37, 7 }
  0x30   : > { %822 = vmatmul.bf16.vlgmr.msra.gmra.mxu0 %v2801_v46  ;;  %v1002_v46 = vor.u32 %v1000_v41, %v970_v43  ;;  %v1003_v0 = vrot.slane %v981_v44, 1 }
  0x31   : > { %851 = vmatmul.bf16.vlgmr.msra.gmra.mxu1 %v2805_v47  ;;  %1150 = vmatpush.bf16.msrb.mxu0 %v3499_v48  ;;  %v999_v40 = vor.u32 %v998_v39, %v963_v37  ;;  %v968_v47 = vor.u32 %v966_v36, %v965_v45 }
  0x32   : > { %1183 = vmatpush.bf16.msrb.mxu1 %v3503_v63  ;;  %v1004_v49 = vsel %vm997_vm0, %v1002_v46, %v1003_v0  ;;  %v1005_v56 = vor.u32 %v1003_v0, %v978_v53  ;;  %v986_v63 = vshrl.u32 %v3751_v23, 16 }
  0x33   : > { %v1001_v42 = vsel %vm997_vm0, %v999_v40, %v1000_v41  ;;  %v996_v50 = vsel %vm3907_vm4, 0, %v968_v47 }
  0x34   : > { %v988_v23 = vrot.slane %v986_v63, 7 }
  0x35   : > { %1151 = vmatpush.bf16.msrb.mxu0 %v3498_v61 }
  0x36   : > { %1184 = vmatpush.bf16.msrb.mxu1 %v3502_v1  ;;  %v991_v7 = vor.u32 %v989_v54, %v988_v23 }
  0x39   : > { %1152 = vmatpush.bf16.msrb.mxu0 %v3497_v62  ;;  %v980_v62 = vrot.slane %v978_v53, 7 }
  0x3a   : > { %1185 = vmatpush.bf16.msrb.mxu1 %v3501_v4 }
  0x3b   : > { %v983_v14 = vor.u32 %v981_v44, %v980_v62 }
  0x3d   : > { %1153 = vmatpush.bf16.msrb.mxu0 %v3496_v2  ;;  %v984_v4 = vsel %vm961_vm2, %v972_v52, %v983_v14  ;;  %v3554_v2 = vld [vmem:[%s4561_s6 + $0x28] sm:$0xff] }
  0x3e   : > { %885 = vmatmul.bf16.gmra.mxu2 %v2825_v57  ;;  %1186 = vmatpush.bf16.msrb.mxu1 %v3500_v16  ;;  %v1006_v57 = vrot.slane %v989_v54, 1 }
  0x3f   : > { %914 = vmatmul.bf16.gmra.mxu3 %v2829_v58 }
  0x40   : > { %827 = vmatmul.bf16.gmra.mxu0 %v2817_v59  ;;  %v976_v59 = vsel %vm961_vm2, %v965_v45, %v975_v55  ;;  %v1008_v1 = vor.u32 %v1006_v57, %v986_v63 }
  0x41   : > { %856 = vmatmul.bf16.gmra.mxu1 %v2821_v60  ;;  %1154 = vmatpush.bf16.msrb.mxu0 %v3495_v11  ;;  %v1007_v60 = vsel %vm997_vm0, %v1005_v56, %v1006_v57  ;;  %v992_v11 = vsel %vm961_vm2, %v980_v62, %v991_v7 }
  0x42   : > { %v1012_v5 = vsel %vm3924_vm6, %v1008_v1, 0 }
  0x45   : > { %1155 = vmatpush.bf16.msrb.mxu0 %v3494_v20 }
  0x49   : > { %1156 = vmatpush.bf16.msrb.mxu0 %v3493_v21 }
  0x4d   : > { %1157 = vmatpush.bf16.msrb.mxu0 %v3492_v22 }
  0x4e   : > { %890 = vmatmul.bf16.gmra.mxu2 %v2841_v15 }
  0x4f   : > { %919 = vmatmul.bf16.gmra.mxu3 %v2845_v17 }
  0x50   : > { %832 = vmatmul.bf16.gmra.mxu0 %v2833_v18 }
  0x51   : > { %861 = vmatmul.bf16.gmra.mxu1 %v2837_v19 }
  0x5e   : > { %895 = vmatmul.bf16.gmra.mxu2 %v2857_v32 }
  0x5f   : > { %924 = vmatmul.bf16.gmra.mxu3 %v2861_v33 }
  0x60   : > { %837 = vmatmul.bf16.gmra.mxu0 %v2849_v34 }
  0x61   : > { %866 = vmatmul.bf16.gmra.mxu1 %v2853_v35 }
  0x71   : > { %3054 = vmatmul.msk.bf16.vlgmr.msrb.gmra.mxu1 %vm1021_vm1, %v1001_v42 }
  0x81   : > { %3055 = vmatmul.msk.bf16.gmra.mxu1 %vm1021_vm1, %v1004_v49  ;;  %v1014_v9 = vpop.permute.xlu0 %1013 }
  0x82   : > { %v1024_v51 = vsel %vm1021_vm1, %v996_v50, %v1014_v9 }
  0x83   : > { %1158 = vmatmul.bf16.vlgmr.msrb.gmra.mxu0 %v1024_v51 }
  0x85   : > { %v1018_v3 = vpop.permute.xlu1 %1017 }
  0x86   : > { %v1032_v6 = vsel %vm1021_vm1, %v984_v4, %v1018_v3 }
  0x89   : > { %v1016_v58 = vpop.permute.xlu0 %1015 }
  0x8a   : > { %v1028_v61 = vsel %vm1021_vm1, %v976_v59, %v1016_v58 }
  0x8d   : > { %v1020_v10 = vpop.permute.xlu1 %1019 }
  0x8e   : > { %v1036_v15 = vsel %vm1021_vm1, %v992_v11, %v1020_v10 }
  0x91   : > { %3056 = vmatmul.msk.bf16.gmra.mxu1 %vm1021_vm1, %v1007_v60  ;;  %v3579_v60 = vld [vmem:[%s4560_s5] ss:$0 sm:$0xff] }
  0x93   : > { %1163 = vmatmul.bf16.gmra.mxu0 %v1028_v61 }
  0xa1   : > { %3057 = vmatmul.msk.bf16.gmra.mxu1 %vm1021_vm1, %v1012_v5 }
  0xa3   : > { %1168 = vmatmul.bf16.gmra.mxu0 %v1032_v6 }
  0xad   : > { %v823_v8 = vpop.f32.mrf.mxu0 }
  0xae   : > { %v852_v12 = vpop.f32.mrf.mxu1 }
  0xaf   : > { %v853_v13 = vadd.f32 %v852_v12, %v823_v8 }
  0xb1   : > { %v881_v16 = vpop.f32.mrf.mxu2 }
  0xb2   : > { %v882_v17 = vadd.f32 %v881_v16, %v853_v13  ;;  %v910_v18 = vpop.f32.mrf.mxu3 }
  0xb3   : > { %1173 = vmatmul.bf16.gmra.mxu0 %v1036_v15 }
  0xb4   : > { %v3935_v19 = vadd.f32 %v910_v18, %v882_v17 }
  0xb5   : > { %v3937_v20 = vpop.f32.mrf.mxu0 }
  0xb6   : > { %v3939_v21 = vpop.f32.mrf.mxu1 }
  0xb9   : > { %v3941_v22 = vpop.f32.mrf.mxu2 }
  0xba   : > { %v3943_v24 = vpop.f32.mrf.mxu3 }
  0xbd   : > { %v828_v25 = vpop.f32.mrf.mxu0 }
  0xbe   : > { %v857_v26 = vpop.f32.mrf.mxu1 }
  0xbf   : > { %v858_v27 = vadd.f32 %v857_v26, %v828_v25 }
  0xc1   : > { %v886_v28 = vpop.f32.mrf.mxu2 }
  0xc2   : > { %v887_v29 = vadd.f32 %v886_v28, %v858_v27  ;;  %v915_v30 = vpop.f32.mrf.mxu3 }
  0xc4   : > { %v3945_v31 = vadd.f32 %v915_v30, %v887_v29 }
  0xc5   : > { %v3947_v32 = vpop.f32.mrf.mxu0 }
  0xc6   : > { %v3949_v33 = vpop.f32.mrf.mxu1 }
  0xc9   : > { %v3951_v34 = vpop.f32.mrf.mxu2 }
  0xca   : > { %v3953_v35 = vpop.f32.mrf.mxu3 }
  0xcd   : > { %v833_v36 = vpop.f32.mrf.mxu0 }
  0xce   : > { %v862_v37 = vpop.f32.mrf.mxu1 }
  0xcf   : > { %v863_v38 = vadd.f32 %v862_v37, %v833_v36 }
  0xd1   : > { %v891_v39 = vpop.f32.mrf.mxu2 }
  0xd2   : > { %v892_v40 = vadd.f32 %v891_v39, %v863_v38  ;;  %v920_v41 = vpop.f32.mrf.mxu3 }
  0xd4   : > { %v3955_v42 = vadd.f32 %v920_v41, %v892_v40 }
  0xd5   : > { %v835_v43 = vpop.f32.mrf.mxu0 }
  0xd6   : > { %v864_v44 = vpop.f32.mrf.mxu1 }
  0xd7   : > { %v865_v45 = vadd.f32 %v864_v44, %v835_v43  ;;  %v3507_v44 = vld [vmem:[%s4561_s6 + $0x8] sm:$0xff] }
  0xd8   : > { %1294 = vmatpush.bf16.msrb.mxu3 %v3507_v44 }
  0xd9   : > { %v893_v46 = vpop.f32.mrf.mxu2 }
  0xda   : > { %v894_v0 = vadd.f32 %v893_v46, %v865_v45  ;;  %v922_v47 = vpop.f32.mrf.mxu3 }
  0xdc   : > { %v3957_v49 = vadd.f32 %v922_v47, %v894_v0 }
  0xdd   : > { %v838_v50 = vpop.f32.mrf.mxu0 }
  0xde   : > { %v867_v9 = vpop.f32.mrf.mxu1 }
  0xdf   : > { %v868_v51 = vadd.f32 %v867_v9, %v838_v50 }
  0xe1   : > { %v896_v52 = vpop.f32.mrf.mxu2 }
  0xe2   : > { %v897_v53 = vadd.f32 %v896_v52, %v868_v51  ;;  %v925_v54 = vpop.f32.mrf.mxu3 }
  0xe4   : > { %v3959_v55 = vadd.f32 %v925_v54, %v897_v53 }
  0xe5   : > { %v840_v56 = vpop.f32.mrf.mxu0 }
  0xe6   : > { %v869_v57 = vpop.f32.mrf.mxu1 }
  0xe7   : > { %v3961_v58 = vadd.f32 %v869_v57, %v840_v56  ;;  %v3504_v56 = vld [vmem:[%s4557_s2] sm:$0xff]  ;;  %v3505_v57 = vld [vmem:[%s4557_s2 + $0x8] sm:$0xff] }
  0xee   : > { %v1188_v59 = vpop.f32.mrf.mxu1 }
  0xf6   : > { %v1190_v61 = vpop.f32.mrf.mxu1 }
  0xfe   : > { %v1193_v3 = vpop.f32.mrf.mxu1 }
 0x100   : > { %v1159_v62 = vpop.f32.mrf.mxu0 }
 0x101   : > { %v1160_v63 = vadd.f32 %v3579_v60, %v1159_v62 }
 0x103   : > { %v1189_v14 = vadd.f32 %v1188_v59, %v1160_v63  ;;  %v3506_v59 = vld [vmem:[%s4561_s6] sm:$0xff] }
 0x104   : > { %1295 = vmatpush.bf16.msrb.mxu3 %v3506_v59 }
 0x105   : > { %v1208_v53 = vmax.f32 %v1189_v14, 0.0 }
 0x106   : > { %v1195_v5 = vpop.f32.mrf.mxu1 }
 0x108   : > { %v1161_v1 = vpop.f32.mrf.mxu0 }
 0x109   : > { %v1162_v39 = vadd.f32 %v3579_v60, %v1161_v1 }
 0x10b   : > { %v1191_v0 = vadd.f32 %v1190_v61, %v1162_v39 }
 0x10d   : > { %v1209_v51 = vmax.f32 %v1191_v0, 0.0 }
 0x10e   : > { %v1198_v23 = vpop.f32.mrf.mxu1 }
 0x10f   : > { %v1220_v54 = vpack.c.bf16 %v1209_v51, %v1208_v53 }
 0x110   : > { %v1164_v4 = vpop.f32.mrf.mxu0 }
 0x111   : > { %v1165_v30 = vadd.f32 %v3579_v60, %v1164_v4  ;;  %v3984_v4 = vpop.f32.mrf.mxu3 }
 0x113   : > { %v1194_v45 = vadd.f32 %v1193_v3, %v1165_v30 }
 0x115   : > { %v1210_v9 = vmax.f32 %v1194_v45, 0.0 }
 0x116   : > { %v1200_v8 = vpop.f32.mrf.mxu1 }
 0x118   : > { %v1166_v6 = vpop.f32.mrf.mxu0 }
 0x119   : > { %v1167_v27 = vadd.f32 %v3579_v60, %v1166_v6  ;;  %v3580_v6 = vld [vmem:[%s4562_s7] ss:$0 sm:$0xff] }
 0x11b   : > { %v1196_v40 = vadd.f32 %v1195_v5, %v1167_v27  ;;  %v3989_v5 = vld [vmem:[%s4563_s8 + $0x58] sm:$0xff] }
 0x11c   : > { %1498 = vmatpush.bf16.msra.mxu3 %v3989_v5 }
 0x11d   : > { %v1211_v47 = vmax.f32 %v1196_v40, 0.0 }
 0x11e   : > { %v1203_v11 = vpop.f32.mrf.mxu1 }
 0x11f   : > { %v1221_v52 = vpack.c.bf16 %v1211_v47, %v1210_v9 }
 0x120   : > { %v1169_v7 = vpop.f32.mrf.mxu0 }
 0x121   : > { %v1170_v17 = vadd.f32 %v3579_v60, %v1169_v7 }
 0x123   : > { %v1199_v36 = vadd.f32 %v1198_v23, %v1170_v17  ;;  %v3998_v23 = vld [vmem:[%s4563_s8 + $0x50] sm:$0xff] }
 0x124   : > { %1499 = vmatpush.bf16.msra.mxu3 %v3998_v23 }
 0x125   : > { %v1212_v46 = vmax.f32 %v1199_v36, 0.0 }
 0x126   : > { %v1205_v26 = vpop.f32.mrf.mxu1 }
 0x128   : > { %v1171_v10 = vpop.f32.mrf.mxu0 }
 0x129   : > { %v1172_v15 = vadd.f32 %v3579_v60, %v1171_v10  ;;  %v4004_v10 = vld [vmem:[%s4563_s8 + $0x48] sm:$0xff] }
 0x12a   : > { %1500 = vmatpush.bf16.msra.mxu3 %v4004_v10 }
 0x12b   : > { %v1201_v28 = vadd.f32 %v1200_v8, %v1172_v15 }
 0x12d   : > { %v1213_v41 = vmax.f32 %v1201_v28, 0.0 }
 0x12f   : > { %v1222_v50 = vpack.c.bf16 %v1213_v41, %v1212_v46 }
 0x130   : > { %v1174_v12 = vpop.f32.mrf.mxu0 }
 0x131   : > { %v1175_v13 = vadd.f32 %v3579_v60, %v1174_v12 }
 0x133   : > { %v1204_v18 = vadd.f32 %v1203_v11, %v1175_v13  ;;  %v855_v11 = vadd.f32 %v3939_v21, %v3937_v20  ;;  %v4012_v13 = vld [vmem:[%s4563_s8 + $0x40] sm:$0xff] }
 0x134   : > { %1501 = vmatpush.bf16.msra.mxu3 %v4012_v13 }
 0x135   : > { %v1214_v37 = vmax.f32 %v1204_v18, 0.0  ;;  %v884_v15 = vadd.f32 %v3941_v22, %v855_v11 }
 0x138   : > { %v1176_v16 = vpop.f32.mrf.mxu0 }
 0x139   : > { %v1177_v25 = vadd.f32 %v3579_v60, %v1176_v16  ;;  %v3980_v60 = vpop.f32.mrf.mxu2 }
 0x13b   : > { %v1206_v29 = vadd.f32 %v1205_v26, %v1177_v25  ;;  %v913_v25 = vadd.f32 %v3943_v24, %v884_v15 }
 0x13d   : > { %v1215_v38 = vmax.f32 %v1206_v29, 0.0 }
 0x13f   : > { %v1223_v43 = vpack.c.bf16 %v1215_v38, %v1214_v37 }
 0x141   : > { %1244 = vmatpush.bf16.msrb.mxu2 %v1223_v43 }
 0x145   : > { %1245 = vmatpush.bf16.msrb.mxu2 %v1222_v50 }
 0x149   : > { %1246 = vmatpush.bf16.msrb.mxu2 %v1221_v52 }
 0x14d   : > { %1247 = vmatpush.bf16.msrb.mxu2 %v1220_v54 }
 0x150   : > { %3066 = vmatmul.msk.bf16.vlgmr.msrb.gmra.mxu2 %vm1021_vm1, %v3504_v56 }
 0x160   : > { %3067 = vmatmul.msk.bf16.gmra.mxu2 %vm1021_vm1, %v3505_v57 }
 0x1d3   : > { %v1249_v61 = vpop.f32.mrf.mxu2 }
 0x1db   : > { %v1251_v62 = vpop.f32.mrf.mxu2 }
 0x1dc   : > { %v1259_v63 = vpack.c.bf16 %v1251_v62, %v1249_v61 }
 0x1de   : > { %3076 = vmatmul.msk.bf16.vlgmr.msrb.gmra.mxu3 %vm1281_vm7, %v1259_v63  ;;  %v4052_v63 = vld [vmem:[%s4563_s8 + $0x28] sm:$0xff] }
 0x1e3   : > { %v1254_v14 = vpop.f32.mrf.mxu2 }
 0x1eb   : > { %v1256_v1 = vpop.f32.mrf.mxu2 }
 0x1ec   : > { %v1260_v3 = vpack.c.bf16 %v1256_v1, %v1254_v14 }
 0x1ee   : > { %3077 = vmatmul.msk.bf16.gmra.mxu3 %vm1281_vm7, %v1260_v3 }
 0x261   : > { %v1297_v7 = vpop.f32.mrf.mxu3 }
 0x262   : > { %v1298_v8 = vadd.f32 %v3580_v6, %v1297_v7 }
 0x264   : > { %v1307_v12 = vmax.f32 %v1298_v8, 0.0 }
 0x266   : > { %v1315_v17 = vadd.f32 %v1307_v12, %v3935_v19  ;;  %v1311_v26 = vpack.c.bf16 %v1307_v12, %v1307_v12  ;;  %v860_v19 = vadd.f32 %v3949_v33, %v3947_v32  ;;  %v4032_v32 = vld [vmem:[%s4563_s8 + $0x38] sm:$0xff] }
 0x267   : > { %1475 = vmatpush.bf16.msra.mxu2 %v4032_v32 }
 0x268   : > { %v1319_v21 = vpack.c.bf16 %v1315_v17, %v1315_v17  ;;  %v1676_v29 = vunpack.c.l.b16 %v1311_v26  ;;  %v889_v44 = vadd.f32 %v3951_v34, %v860_v19  ;;  %v4039_v34 = vld [vmem:[%s4563_s8 + $0x30] sm:$0xff] }
 0x269   : > { %v1299_v16 = vpop.f32.mrf.mxu3 }
 0x26a   : > { %v1300_v18 = vadd.f32 %v3580_v6, %v1299_v16  ;;  %v1327_v38 = vunpack.c.l.b16 %v1319_v21  ;;  %v918_v33 = vadd.f32 %v3953_v35, %v889_v44  ;;  %v3532_v35 = vld [vmem:[%s4559_s4 + $0x90] sm:$0xff]  ;;  %v4067_v16 = vld [vmem:[%s4563_s8 + $0x20] sm:$0xff] }
 0x26b   : > { %1476 = vmatpush.bf16.msra.mxu2 %v4039_v34 }
 0x26c   : > { %v1308_v20 = vmax.f32 %v1300_v18, 0.0 }
 0x26e   : > { %v1312_v27 = vpack.c.bf16 %v1308_v20, %v1308_v20  ;;  %v1316_v28 = vadd.f32 %v1308_v20, %v913_v25 }
 0x26f   : > { %1477 = vmatpush.bf16.msra.mxu2 %v4052_v63 }
 0x270   : > { %v1320_v30 = vpack.c.bf16 %v1316_v28, %v1316_v28  ;;  %v1677_v36 = vunpack.c.l.b16 %v1312_v27 }
 0x271   : > { %v1302_v37 = vpop.f32.mrf.mxu3 }
 0x272   : > { %v1328_v39 = vunpack.c.l.b16 %v1320_v30  ;;  %v1303_v22 = vadd.f32 %v3580_v6, %v1302_v37  ;;  %v4018_v40 = vpack.c.b16 %v1677_v36, %v1676_v29  ;;  %v4080_v37 = vld [vmem:[%s4563_s8 + $0x18] sm:$0xff] }
 0x273   : > { %1478 = vmatpush.bf16.msra.mxu2 %v4067_v16 }
 0x274   : > { %1706 = vrot.lane.b32.xlu0 %v4018_v40, %s3621_s18  ;;  %v1331_v24 = vpack.c.b16 %v1328_v39, %v1327_v38  ;;  %v1309_v41 = vmax.f32 %v1303_v22, 0.0  ;;  %v1686_v53 = vshll.u32 %v4018_v40, 16  ;;  %v1683_v7 = vshrl.u32 %v4018_v40, 16 }
 0x276   : > { %1357 = vrot.lane.b32.xlu2 %v1331_v24, %s3621_s18  ;;  %v1334_v43 = vshrl.u32 %v1331_v24, 16  ;;  %v1337_v45 = vshll.u32 %v1331_v24, 16  ;;  %v1317_v47 = vadd.f32 %v1309_v41, %v3945_v31  ;;  %v1313_v51 = vpack.c.bf16 %v1309_v41, %v1309_v41  ;;  %v3533_v31 = vld [vmem:[%s4559_s4 + $0x98] sm:$0xff]  ;;  %v4090_v24 = vld [vmem:[%s4563_s8 + $0x10] sm:$0xff]  ;;  %v4096_v41 = vld [vmem:[%s4563_s8 + $0x8] sm:$0xff] }
 0x277   : > { %1826 = vmatpush.bf16.msra.mxu1 %v3533_v31  ;;  %v1699_v14 = vrot.slane %v1686_v53, 1  ;;  %v1685_v27 = vrot.slane %v1683_v7, 7  ;;  %1479 = vmatpush.bf16.msra.mxu2 %v4080_v37  ;;  %v3536_v31 = vld [vmem:[%s4559_s4 + $0xb0] sm:$0xff] }
 0x278   : > { %v1336_v46 = vrot.slane %v1334_v43, 7  ;;  %v1321_v54 = vpack.c.bf16 %v1317_v47, %v1317_v47  ;;  %v1678_v59 = vunpack.c.l.b16 %v1313_v51  ;;  %v1350_v8 = vrot.slane %v1337_v45, 1  ;;  %v3529_v47 = vld [vmem:[%s4559_s4 + $0x78] sm:$0xff] }
 0x279   : > { %v1304_v0 = vpop.f32.mrf.mxu3  ;;  %v1700_v17 = vor.u32 %v1699_v14, %v1683_v7  ;;  %v3537_v51 = vld [vmem:[%s4559_s4 + $0xb8] sm:$0xff]  ;;  %v1688_v14 = vor.u32 %v1686_v53, %v1685_v27 }
 0x27a   : > { %v1305_v50 = vadd.f32 %v3580_v6, %v1304_v0  ;;  %v4027_v9 = vor.u32 %v1337_v45, %v1336_v46  ;;  %v1329_v1 = vunpack.c.l.b16 %v1321_v54  ;;  %v1351_v21 = vor.u32 %v1350_v8, %v1334_v43  ;;  %v4102_v43 = vld [vmem:[%s4563_s8] sm:$0xff]  ;;  %v3535_v54 = vld [vmem:[%s4559_s4 + $0xa8] sm:$0xff] }
 0x27b   : > { %1827 = vmatpush.bf16.msra.mxu1 %v3532_v35  ;;  %1480 = vmatpush.bf16.msra.mxu2 %v4090_v24  ;;  %v3530_v0 = vld [vmem:[%s4559_s4 + $0x80] sm:$0xff] }
 0x27c   : > { %v1310_v52 = vmax.f32 %v1305_v50, 0.0  ;;  %v3528_v50 = vld [vmem:[%s4559_s4 + $0x70] sm:$0xff]  ;;  %v1349_v35 = vsel %vm3907_vm4, 0, %v4027_v9 }
 0x27e   : > { %v1314_v56 = vpack.c.bf16 %v1310_v52, %v1310_v52  ;;  %v1318_v57 = vadd.f32 %v1310_v52, %v918_v33  ;;  %v3527_v33 = vld [vmem:[%s4559_s4 + $0x68] sm:$0xff]  ;;  %v3526_v52 = vld [vmem:[%s4559_s4 + $0x60] sm:$0xff] }
 0x27f   : > { %1481 = vmatpush.bf16.msra.mxu2 %v4096_v41 }
 0x280   : > { %v1322_v61 = vpack.c.bf16 %v1318_v57, %v1318_v57  ;;  %v1679_v62 = vunpack.c.l.b16 %v1314_v56  ;;  %v3534_v56 = vld [vmem:[%s4559_s4 + $0xa0] sm:$0xff] }
 0x282   : > { %v1330_v3 = vunpack.c.l.b16 %v1322_v61  ;;  %v4056_v6 = vpack.c.b16 %v1679_v62, %v1678_v59 }
 0x283   : > { %1482 = vmatpush.bf16.msra.mxu2 %v4102_v43 }
 0x284   : > { %1708 = vrot.lane.b32.xlu1 %v4056_v6, %s3621_s18  ;;  %v1690_v11 = vshrl.u32 %v4056_v6, 16  ;;  %v1693_v12 = vshll.u32 %v4056_v6, 16  ;;  %v1332_v15 = vpack.c.b16 %v1330_v3, %v1329_v1  ;;  %v1698_v3 = vsel %vm3907_vm4, 0, %v1688_v14 }
 0x286   : > { %1359 = vrot.lane.b32.xlu2 %v1332_v15, %s3621_s18  ;;  %v1344_v18 = vshll.u32 %v1332_v15, 16  ;;  %v1341_v25 = vshrl.u32 %v1332_v15, 16  ;;  %v4070_v26 = vrot.slane %v1693_v12, 1  ;;  %v1692_v20 = vrot.slane %v1690_v11, 7  ;;  %v4163_v15 = vld [vmem:[%s4564_s9] ss:$0 sm:$0xff] }
 0x287   : > { %1849 = vmatpush.bf16.msrb.mxu2 %v3537_v51 }
 0x288   : > { %v1352_v28 = vrot.slane %v1344_v18, 1  ;;  %v1343_v29 = vrot.slane %v1341_v25, 7  ;;  %v1702_v30 = vsel %vm997_vm0, %v1700_v17, %v4070_v26  ;;  %v1695_v36 = vor.u32 %v1693_v12, %v1692_v20 }
 0x289   : > { %v1703_v12 = vor.u32 %v4070_v26, %v1690_v11 }
 0x28a   : > { %v1353_v38 = vsel %vm997_vm0, %v1351_v21, %v1352_v28  ;;  %v1346_v39 = vor.u32 %v1344_v18, %v1343_v29  ;;  %v1696_v22 = vsel %vm961_vm2, %v1685_v27, %v1695_v36  ;;  %v1354_v44 = vor.u32 %v1352_v28, %v1341_v25 }
 0x28b   : > { %3126 = vmatmul.msk.bf16.vlgmr.msra.gmra.mxu3 %vm1021_vm1, %v1353_v38  ;;  %1850 = vmatpush.bf16.msrb.mxu2 %v3536_v31  ;;  %v1705_v40 = vsel %vm3924_vm6, %v1703_v12, 0 }
 0x28c   : > { %v1347_v19 = vsel %vm961_vm2, %v1336_v46, %v1346_v39  ;;  %v1356_v45 = vsel %vm3924_vm6, %v1354_v44, 0  ;;  %v3531_v46 = vld [vmem:[%s4559_s4 + $0x88] sm:$0xff] }
 0x28d   : > { %1828 = vmatpush.bf16.msra.mxu1 %v3531_v46 }
 0x28f   : > { %1851 = vmatpush.bf16.msrb.mxu2 %v3535_v54 }
 0x291   : > { %1829 = vmatpush.bf16.msra.mxu1 %v3530_v0 }
 0x293   : > { %1852 = vmatpush.bf16.msrb.mxu2 %v3534_v56 }
 0x295   : > { %1830 = vmatpush.bf16.msra.mxu1 %v3529_v47 }
 0x299   : > { %1831 = vmatpush.bf16.msra.mxu1 %v3528_v50 }
 0x29b   : > { %3127 = vmatmul.msk.bf16.gmra.mxu3 %vm1021_vm1, %v1356_v45 }
 0x29d   : > { %1832 = vmatpush.bf16.msra.mxu1 %v3527_v33 }
 0x2a1   : > { %1833 = vmatpush.bf16.msra.mxu1 %v3526_v52 }
 0x2a5   : > { %1987 = vmatpush.bf16.msrb.mxu1 %v3989_v5 }
 0x2a9   : > { %1988 = vmatpush.bf16.msrb.mxu1 %v3998_v23 }
 0x2ad   : > { %1989 = vmatpush.bf16.msrb.mxu1 %v4004_v10 }
 0x2b1   : > { %1990 = vmatpush.bf16.msrb.mxu1 %v4012_v13 }
 0x2d0   : > { %v1358_v57 = vpop.permute.xlu2 %1357 }
 0x2d1   : > { %v1363_v59 = vsel %vm1021_vm1, %v1349_v35, %v1358_v57 }
 0x2d2   : > { %1483 = vmatmul.bf16.vlgmr.msra.gmra.mxu2 %v1363_v59 }
 0x2e0   : > { %v1360_v61 = vpop.permute.xlu2 %1359 }
 0x2e1   : > { %v1367_v62 = vsel %vm1021_vm1, %v1347_v19, %v1360_v61 }
 0x2e2   : > { %1488 = vmatmul.bf16.gmra.mxu2 %v1367_v62 }
 0x2e6   : > { %v1707_v1 = vpop.permute.xlu0 %1706 }
 0x2e7   : > { %v1712_v7 = vsel %vm1021_vm1, %v1698_v3, %v1707_v1 }
 0x2e8   : > { %1834 = vmatmul.bf16.vlgmr.msra.gmra.mxu1 %v1712_v7 }
 0x2f2   : > { %3227 = vmatmul.msk.bf16.vlgmr.msrb.gmra.mxu2 %vm1021_vm1, %v1702_v30 }
 0x2f6   : > { %v1709_v9 = vpop.permute.xlu1 %1708 }
 0x2f7   : > { %v1716_v8 = vsel %vm1021_vm1, %v1696_v22, %v1709_v9 }
 0x2f8   : > { %1839 = vmatmul.bf16.gmra.mxu1 %v1716_v8 }
 0x302   : > { %3228 = vmatmul.msk.bf16.gmra.mxu2 %vm1021_vm1, %v1705_v40 }
 0x30e   : > { %v1503_v53 = vpop.f32.mrf.mxu3 }
 0x316   : > { %v1505_v20 = vpop.f32.mrf.mxu3 }
 0x31e   : > { %v1508_v30 = vpop.f32.mrf.mxu3 }
 0x326   : > { %v1510_v52 = vpop.f32.mrf.mxu3 }
 0x355   : > { %v1484_v17 = vpop.f32.mrf.mxu2 }
 0x356   : > { %v1485_v18 = vadd.f32 %v4163_v15, %v1484_v17 }
 0x358   : > { %v1504_v25 = vadd.f32 %v1503_v53, %v1485_v18 }
 0x35a   : > { %v1513_v6 = vmax.f32 %v1504_v25, 0.0 }
 0x35c   : > { %v1517_v27 = vpack.c.bf16 %v1513_v6, %v1513_v6 }
 0x35d   : > { %v1486_v21 = vpop.f32.mrf.mxu2 }
 0x35e   : > { %v1487_v11 = vadd.f32 %v4163_v15, %v1486_v21  ;;  %v1525_v38 = vunpack.c.l.b16 %v1517_v27 }
 0x360   : > { %v1506_v26 = vadd.f32 %v1505_v20, %v1487_v11 }
 0x362   : > { %v1514_v28 = vmax.f32 %v1506_v26, 0.0  ;;  %v3582_v26 = vld [vmem:[%s4560_s5 + $0x1] ss:$0 sm:$0xff] }
 0x364   : > { %v1518_v29 = vpack.c.bf16 %v1514_v28, %v1514_v28 }
 0x365   : > { %v1489_v36 = vpop.f32.mrf.mxu2  ;;  %v1835_v46 = vpop.f32.mrf.mxu1 }
 0x366   : > { %v1526_v39 = vunpack.c.l.b16 %v1518_v29  ;;  %v1490_v22 = vadd.f32 %v4163_v15, %v1489_v36 }
 0x368   : > { %v1529_v19 = vpack.c.b16 %v1526_v39, %v1525_v38  ;;  %v1509_v44 = vadd.f32 %v1508_v30, %v1490_v22  ;;  %v1836_v39 = vadd.f32 %v3582_v26, %v1835_v46  ;;  %v4189_v46 = vld [vmem:[%s4565_s10 + $0x28] sm:$0xff] }
 0x369   : > { %1633 = vmatpush.bf16.msra.mxu0 %v4189_v46  ;;  %2033 = vmatpush.bf16.msra.mxu2 %v4189_v46 }
 0x36a   : > { %1555 = vrot.lane.b32.xlu2 %v1529_v19, %s3622_s14  ;;  %v1532_v45 = vshrl.u32 %v1529_v19, 16  ;;  %v1535_v47 = vshll.u32 %v1529_v19, 16  ;;  %v1515_v33 = vmax.f32 %v1509_v44, 0.0 }
 0x36c   : > { %v1534_v0 = vrot.slane %v1532_v45, 7  ;;  %v1519_v56 = vpack.c.bf16 %v1515_v33, %v1515_v33  ;;  %v1548_v3 = vrot.slane %v1535_v47, 1 }
 0x36d   : > { %v1491_v50 = vpop.f32.mrf.mxu2  ;;  %v1837_v59 = vpop.f32.mrf.mxu1 }
 0x36e   : > { %v1492_v51 = vadd.f32 %v4163_v15, %v1491_v50  ;;  %v4170_v31 = vor.u32 %v1535_v47, %v1534_v0  ;;  %v1527_v62 = vunpack.c.l.b16 %v1519_v56  ;;  %v1549_v8 = vor.u32 %v1548_v3, %v1532_v45  ;;  %v4202_v56 = vld [vmem:[%s4565_s10 + $0x18] sm:$0xff] }
 0x36f   : > { %v1838_v29 = vadd.f32 %v3582_v26, %v1837_v59  ;;  %v4223_v59 = vld [vmem:[%s4565_s10] sm:$0xff] }
 0x370   : > { %v1511_v54 = vadd.f32 %v1510_v52, %v1492_v51  ;;  %v3538_v52 = vld [vmem:[%s4557_s2] sm:$0xff] }
 0x372   : > { %v1516_v57 = vmax.f32 %v1511_v54, 0.0  ;;  %v4195_v54 = vld [vmem:[%s4565_s10 + $0x20] sm:$0xff] }
 0x373   : > { %1634 = vmatpush.bf16.msra.mxu0 %v4195_v54  ;;  %2034 = vmatpush.bf16.msra.mxu2 %v4195_v54 }
 0x374   : > { %v1520_v35 = vpack.c.bf16 %v1516_v57, %v1516_v57  ;;  %v4209_v57 = vld [vmem:[%s4565_s10 + $0x10] sm:$0xff] }
 0x375   : > { %v1854_v61 = vpop.f32.mrf.mxu2  ;;  %v1840_v25 = vpop.f32.mrf.mxu1 }
 0x376   : > { %v1528_v14 = vunpack.c.l.b16 %v1520_v35  ;;  %v1841_v28 = vadd.f32 %v3582_v26, %v1840_v25  ;;  %v1855_v44 = vadd.f32 %v1854_v61, %v1836_v39  ;;  %v4216_v35 = vld [vmem:[%s4565_s10 + $0x8] sm:$0xff]  ;;  %v4255_v25 = vld [vmem:[%s4566_s11] ss:$0 sm:$0xff] }
 0x377   : > { %1635 = vmatpush.bf16.msra.mxu0 %v4202_v56  ;;  %2035 = vmatpush.bf16.msra.mxu2 %v4202_v56 }
 0x378   : > { %v1530_v1 = vpack.c.b16 %v1528_v14, %v1527_v62  ;;  %v1547_v62 = vsel %vm3907_vm4, 0, %v4170_v31  ;;  %v3539_v31 = vld [vmem:[%s4561_s6 + $0x10] sm:$0xff] }
 0x37a   : > { %1557 = vrot.lane.b32.xlu1 %v1530_v1, %s3622_s14  ;;  %v1542_v7 = vshll.u32 %v1530_v1, 16  ;;  %v1539_v9 = vshrl.u32 %v1530_v1, 16 }
 0x37b   : > { %1636 = vmatpush.bf16.msra.mxu0 %v4209_v57  ;;  %2036 = vmatpush.bf16.msra.mxu2 %v4209_v57 }
 0x37c   : > { %v1550_v12 = vrot.slane %v1542_v7, 1  ;;  %v1541_v40 = vrot.slane %v1539_v9, 7 }
 0x37d   : > { %v1856_v53 = vpop.f32.mrf.mxu2  ;;  %v1842_v27 = vpop.f32.mrf.mxu1 }
 0x37e   : > { %v1551_v17 = vsel %vm997_vm0, %v1549_v8, %v1550_v12  ;;  %v1552_v18 = vor.u32 %v1550_v12, %v1539_v9  ;;  %v1544_v20 = vor.u32 %v1542_v7, %v1541_v40  ;;  %v1843_v30 = vadd.f32 %v3582_v26, %v1842_v27  ;;  %v3540_v9 = vld [vmem:[%s4561_s6 + $0x18] sm:$0xff] }
 0x37f   : > { %1560 = vrot.lane.b32.xlu0 %v1551_v17, %s3621_s18  ;;  %v1857_v22 = vadd.f32 %v1856_v53, %v1838_v29  ;;  %1637 = vmatpush.bf16.msra.mxu0 %v4216_v35  ;;  %vm2619_vm0 = vcmask 1041408  }
 0x380   : > { %v1554_v21 = vsel %vm3924_vm6, %v1552_v18, 0  ;;  %v1545_v6 = vsel %vm961_vm2, %v1534_v0, %v1544_v20  ;;  %v1864_v0 = vmax.f32 %v1855_v44, 0.0  ;;  %2037 = vmatpush.bf16.msra.mxu2 %v4216_v35  ;;  %v3584_v20 = vld [vmem:[%s4567_s12] ss:$0 sm:$0xff]  ;;  %vm2620_vm2 = vsmask.f32 1280 }
 0x381   : > { %1562 = vrot.lane.b32.xlu2 %v1554_v21, %s3621_s18  ;;  %v1865_v50 = vmax.f32 %v1857_v22, 0.0  ;;  %vm4523_vm3 = vmand %vm2619_vm0, %vm2620_vm2 }
 0x383   : > { %v1870_v51 = vpack.c.bf16 %v1865_v50, %v1864_v0  ;;  %1638 = vmatpush.bf16.msra.mxu0 %v4223_v59 }
 0x384   : > { %2038 = vmatpush.bf16.msra.mxu2 %v4223_v59 }
 0x385   : > { %v1859_v11 = vpop.f32.mrf.mxu2 }
 0x386   : > { %v1860_v36 = vadd.f32 %v1859_v11, %v1841_v28  ;;  %v930_v11 = vlaneseq }
 0x387   : > { %1969 = vmatpush.bf16.msrb.mxu0 %v4032_v32 }
 0x388   : > { %v1866_v45 = vmax.f32 %v1860_v36, 0.0  ;;  %v4261_v28 = vand.u32 127, %v930_v11  ;;  %2268 = vmatpush.bf16.msrb.mxu2 %v3554_v2 }
 0x38a   : > { %vm932_vm9 = vcmp.lt.s32.totalorder %v4261_v28, 2 }
 0x38b   : > { %1970 = vmatpush.bf16.msrb.mxu0 %v4039_v34 }
 0x38d   : > { %v1861_v38 = vpop.f32.mrf.mxu2 }
 0x38e   : > { %v1862_v19 = vadd.f32 %v1861_v38, %v1843_v30 }
 0x38f   : > { %1971 = vmatpush.bf16.msrb.mxu0 %v4052_v63 }
 0x390   : > { %v1867_v47 = vmax.f32 %v1862_v19, 0.0 }
 0x392   : > { %v1871_v33 = vpack.c.bf16 %v1867_v47, %v1866_v45 }
 0x393   : > { %1972 = vmatpush.bf16.msrb.mxu0 %v4067_v16 }
 0x394   : > { %1886 = vmatpush.bf16.msrb.mxu3 %v1871_v33 }
 0x397   : > { %1973 = vmatpush.bf16.msrb.mxu0 %v4080_v37 }
 0x398   : > { %1887 = vmatpush.bf16.msrb.mxu3 %v1870_v51 }
 0x39b   : > { %3233 = vmatmul.msk.bf16.vlgmr.msrb.gmra.mxu3 %vm1281_vm7, %v3538_v52  ;;  %1974 = vmatpush.bf16.msrb.mxu0 %v4090_v24 }
 0x39c   : > { %1926 = vmatpush.bf16.msra.mxu3 %v3540_v9  ;;  %v3585_v9 = vld [vmem:[%s4562_s7 + $0x1] ss:$0 sm:$0xff] }
 0x39f   : > { %1975 = vmatpush.bf16.msrb.mxu0 %v4096_v41 }
 0x3a0   : > { %1927 = vmatpush.bf16.msra.mxu3 %v3539_v31  ;;  %v3546_v31 = vld [vmem:[%s4559_s4 + $0xe8] sm:$0xff] }
 0x3a3   : > { %1976 = vmatpush.bf16.msrb.mxu0 %v4102_v43 }
 0x3c4   : > { %v1556_v61 = vpop.permute.xlu2 %1555 }
 0x3c5   : > { %v1566_v14 = vsel %vm1281_vm7, %v1547_v62, %v1556_v61 }
 0x3db   : > { %v1563_v12 = vpop.permute.xlu2 %1562 }
 0x3ec   : > { %v1558_v7 = vpop.permute.xlu1 %1557 }
 0x3ed   : > { %v1569_v8 = vsel %vm1281_vm7, %v1545_v6, %v1558_v7  ;;  %v3548_v7 = vld [vmem:[%s4559_s4 + $0xf8] sm:$0xff] }
 0x3ee   : > { %v1573_v40 = vsel %vm1021_vm1, %v1569_v8, %v1563_v12  ;;  %2187 = vmatpush.bf16.msrb.mxu3 %v3548_v7  ;;  %v3547_v8 = vld [vmem:[%s4559_s4 + $0xf0] sm:$0xff]  ;;  %v3549_v7 = vld [vmem:[%s4559_s4 + $0x100] sm:$0xff] }
 0x3f1   : > { %v1561_v1 = vpop.permute.xlu0 %1560 }
 0x3f2   : > { %v1571_v3 = vsel %vm1021_vm1, %v1566_v14, %v1561_v1  ;;  %2188 = vmatpush.bf16.msrb.mxu3 %v3547_v8 }
 0x3f3   : > { %3152 = vmatmul.msk.bf16.vlgmr.msra.gmra.mxu0 %vm1626_vm8, %v1571_v3 }
 0x3f6   : > { %2189 = vmatpush.bf16.msrb.mxu3 %v3546_v31 }
 0x403   : > { %3153 = vmatmul.msk.bf16.gmra.mxu0 %vm1626_vm8, %v1573_v40 }
 0x41e   : > { %v1889_v53 = vpop.f32.mrf.mxu3 }
 0x426   : > { %v1891_v17 = vpop.f32.mrf.mxu3 }
 0x427   : > { %v1894_v18 = vpack.c.bf16 %v1891_v17, %v1889_v53  ;;  %v3545_v17 = vld [vmem:[%s4559_s4 + $0xe0] sm:$0xff] }
 0x428   : > { %2190 = vmatpush.bf16.msrb.mxu3 %v3545_v17 }
 0x429   : > { %3247 = vmatmul.msk.bf16.vlgmr.msra.gmra.mxu3 %vm1281_vm7, %v1894_v18 }
 0x470   : > { %v1640_v21 = vpop.f32.mrf.mxu0 }
 0x471   : > { %v1641_v6 = vadd.f32 %v4255_v25, %v1640_v21 }
 0x473   : > { %v1654_v26 = vmul.f32 %v3584_v20, %v1641_v6 }
 0x475   : > { %v1658_v27 = vmul.f32 1.442695, %v1654_v26 }
 0x477   : > { %3593 = vpow2.f32 %v1658_v27 }
 0x478   : > { %v1642_v29 = vpop.f32.mrf.mxu0 }
 0x479   : > { %v1643_v30 = vadd.f32 %v4255_v25, %v1642_v29 }
 0x47b   : > { %v1655_v36 = vmul.f32 %v3584_v20, %v1643_v30 }
 0x47d   : > { %v3594_v38 = vpop.eup %3593  ;;  %v1660_v39 = vmul.f32 1.442695, %v1655_v36  ;;  %v3543_v36 = vld [vmem:[%s4559_s4 + $0xd0] sm:$0xff] }
 0x47e   : > { %v1668_v22 = vsel %vm932_vm9, %v3594_v38, %v1641_v6  ;;  %v3544_v6 = vld [vmem:[%s4559_s4 + $0xd8] sm:$0xff] }
 0x47f   : > { %2712 = vst.msk [vmem:[%s4269_s16] sm:$0xff] %vm2711_vm10, %v1668_v22  ;;  %3595 = vpow2.f32 %v1660_v39  ;;  %2191 = vmatpush.bf16.msrb.mxu3 %v3544_v6 }
 0x480   : > { %v1645_v19 = vpop.f32.mrf.mxu0 }
 0x481   : > { %v1646_v44 = vadd.f32 %v4255_v25, %v1645_v19 }
 0x483   : > { %v1656_v45 = vmul.f32 %v3584_v20, %v1646_v44  ;;  %2192 = vmatpush.bf16.msrb.mxu3 %v3543_v36 }
 0x485   : > { %v3596_v47 = vpop.eup %3595  ;;  %v1662_v50 = vmul.f32 1.442695, %v1656_v45  ;;  %v3542_v45 = vld [vmem:[%s4559_s4 + $0xc8] sm:$0xff] }
 0x486   : > { %v1669_v33 = vsel %vm932_vm9, %v3596_v47, %v1643_v30 }
 0x487   : > { %2713 = vst.msk [vmem:[%s4269_s16 + $0x8] sm:$0xff] %vm2711_vm10, %v1669_v33  ;;  %3597 = vpow2.f32 %v1662_v50  ;;  %2193 = vmatpush.bf16.msrb.mxu3 %v3542_v45  ;;  %v3541_v33 = vld [vmem:[%s4559_s4 + $0xc0] sm:$0xff] }
 0x488   : > { %v1647_v0 = vpop.f32.mrf.mxu0 }
 0x489   : > { %v1648_v51 = vadd.f32 %v4255_v25, %v1647_v0 }
 0x48b   : > { %v1657_v52 = vmul.f32 %v3584_v20, %v1648_v51  ;;  %2194 = vmatpush.bf16.msrb.mxu3 %v3541_v33 }
 0x48d   : > { %v3598_v61 = vpop.eup %3597  ;;  %v1664_v62 = vmul.f32 1.442695, %v1657_v52 }
 0x48e   : > { %v1670_v14 = vsel %vm932_vm9, %v3598_v61, %v1646_v44 }
 0x48f   : > { %2714 = vst.msk [vmem:[%s4269_s16 + $0x10] sm:$0xff] %vm2711_vm10, %v1670_v14  ;;  %3599 = vpow2.f32 %v1664_v62  ;;  %v3552_v14 = vld [vmem:[%s4559_s4 + $0x118] sm:$0xff] }
 0x490   : > { %2205 = vmatpush.bf16.msra.mxu0 %v3552_v14 }
 0x495   : > { %v3600_v1 = vpop.eup %3599 }
 0x496   : > { %v1671_v3 = vsel %vm932_vm9, %v3600_v1, %v1648_v51  ;;  %v3551_v1 = vld [vmem:[%s4559_s4 + $0x110] sm:$0xff] }
 0x497   : > { %2715 = vst.msk [vmem:[%s4269_s16 + $0x18] sm:$0xff] %vm2711_vm10, %v1671_v3  ;;  %2206 = vmatpush.bf16.msra.mxu0 %v3551_v1  ;;  %v3550_v3 = vld [vmem:[%s4559_s4 + $0x108] sm:$0xff] }
 0x49b   : > { %2207 = vmatpush.bf16.msra.mxu0 %v3550_v3 }
 0x49f   : > { %2208 = vmatpush.bf16.msra.mxu0 %v3549_v7 }
 0x4ac   : > { %v1929_v12 = vpop.f32.mrf.mxu3 }
 0x4ad   : > { %v1930_v40 = vadd.f32 %v3585_v9, %v1929_v12 }
 0x4af   : > { %v1934_v53 = vmax.f32 %v1930_v40, 0.0 }
 0x4b1   : > { %v1938_v20 = vadd.f32 %v1934_v53, %v3955_v42  ;;  %v1936_v11 = vpack.c.bf16 %v1934_v53, %v1934_v53 }
 0x4b3   : > { %v1940_v27 = vpack.c.bf16 %v1938_v20, %v1938_v20  ;;  %v2060_v38 = vunpack.c.l.b16 %v1936_v11 }
 0x4b4   : > { %v1931_v18 = vpop.f32.mrf.mxu3 }
 0x4b5   : > { %v1932_v21 = vadd.f32 %v3585_v9, %v1931_v18  ;;  %v1944_v22 = vunpack.c.l.b16 %v1940_v27 }
 0x4b7   : > { %v1935_v26 = vmax.f32 %v1932_v21, 0.0 }
 0x4b9   : > { %v1937_v29 = vpack.c.bf16 %v1935_v26, %v1935_v26  ;;  %v1939_v30 = vadd.f32 %v1935_v26, %v3957_v49 }
 0x4bb   : > { %v1941_v39 = vpack.c.bf16 %v1939_v30, %v1939_v30  ;;  %v2061_v42 = vunpack.c.l.b16 %v1937_v29 }
 0x4bd   : > { %v1945_v19 = vunpack.c.l.b16 %v1941_v39  ;;  %v2062_v44 = vpack.c.b16 %v2061_v42, %v2060_v38 }
 0x4bf   : > { %2076 = vrot.lane.b32.xlu1 %v2062_v44, %s3621_s18  ;;  %v1946_v47 = vpack.c.b16 %v1945_v19, %v1944_v22  ;;  %v2064_v9 = vshrl.u32 %v2062_v44, 16  ;;  %v2067_v12 = vshll.u32 %v2062_v44, 16 }
 0x4c1   : > { %1960 = vrot.lane.b32.xlu0 %v1946_v47, %s3621_s18  ;;  %v1948_v49 = vshrl.u32 %v1946_v47, 16  ;;  %v1951_v50 = vshll.u32 %v1946_v47, 16  ;;  %v2066_v8 = vrot.slane %v2064_v9, 7  ;;  %v2072_v6 = vrot.slane %v2067_v12, 1 }
 0x4c3   : > { %v1956_v0 = vrot.slane %v1951_v50, 1  ;;  %v1950_v51 = vrot.slane %v1948_v49, 7  ;;  %v2069_v40 = vor.u32 %v2067_v12, %v2066_v8  ;;  %v2073_v11 = vor.u32 %v2072_v6, %v2064_v9  ;;  %v2217_v6 = vld [vmem:[%s4557_s2] sm:$0xf] }
 0x4c5   : > { %v1957_v52 = vor.u32 %v1956_v0, %v1948_v49  ;;  %v1953_v61 = vor.u32 %v1951_v50, %v1950_v51  ;;  %v2071_v53 = vsel %vm3907_vm4, 0, %v2069_v40  ;;  %v2075_v26 = vsel %vm3924_vm6, %v2073_v11, 0  ;;  %v3586_v0 = vld [vmem:[%s4560_s5 + $0x2] ss:$0 sm:$0xff] }
 0x4c6   : > { %v3553_v11 = vld [vmem:[%s4561_s6 + $0x20] sm:$0xff] }
 0x4c7   : > { %v1959_v62 = vsel %vm3924_vm6, %v1957_v52, 0  ;;  %v1955_v20 = vsel %vm3907_vm4, 0, %v1953_v61  ;;  %2269 = vmatpush.bf16.msrb.mxu2 %v3553_v11 }
 0x4c8   : > { %3248 = vmatmul.msk.bf16.vlgmr.msrb.gmra.mxu1 %vm1021_vm1, %v1959_v62 }
 0x531   : > { %v2077_v31 = vpop.permute.xlu1 %2076 }
 0x532   : > { %v2080_v17 = vsel %vm1021_vm1, %v2071_v53, %v2077_v31 }
 0x533   : > { %v1961_v18 = vpop.permute.xlu0 %1960  ;;  %2195 = vmatmul.bf16.vlgmr.msrb.gmra.mxu3 %v2080_v17 }
 0x534   : > { %v1964_v21 = vsel %vm1021_vm1, %v1955_v20, %v1961_v18 }
 0x535   : > { %1977 = vmatmul.bf16.vlgmr.msrb.gmra.mxu0 %v1964_v21 }
 0x536   : > { %2307 = vmatpush.bf16.msrb.mxu0 %v4032_v32 }
 0x53a   : > { %2308 = vmatpush.bf16.msrb.mxu0 %v4039_v34 }
 0x53e   : > { %2309 = vmatpush.bf16.msrb.mxu0 %v4052_v63 }
 0x542   : > { %2310 = vmatpush.bf16.msrb.mxu0 %v4067_v16 }
 0x545   : > { %3324 = vmatmul.msk.bf16.vlgmr.msra.gmra.mxu0 %vm1021_vm1, %v2075_v26  ;;  %v1992_v27 = vpop.f32.mrf.mxu1 }
 0x546   : > { %2311 = vmatpush.bf16.msrb.mxu0 %v4080_v37 }
 0x54a   : > { %2312 = vmatpush.bf16.msrb.mxu0 %v4090_v24 }
 0x54d   : > { %v1994_v22 = vpop.f32.mrf.mxu1 }
 0x54e   : > { %2313 = vmatpush.bf16.msrb.mxu0 %v4096_v41 }
 0x552   : > { %2314 = vmatpush.bf16.msrb.mxu0 %v4102_v43 }
 0x5b2   : > { %v1978_v29 = vpop.f32.mrf.mxu0 }
 0x5b3   : > { %v1979_v30 = vadd.f32 %v4163_v15, %v1978_v29 }
 0x5b5   : > { %v1993_v36 = vadd.f32 %v1992_v27, %v1979_v30 }
 0x5b6   : > { %v2196_v19 = vpop.f32.mrf.mxu3 }
 0x5b7   : > { %v1997_v39 = vmax.f32 %v1993_v36, 0.0  ;;  %v2197_v62 = vadd.f32 %v3586_v0, %v2196_v19  ;;  %v3587_v36 = vld [vmem:[%s4567_s12 + $0x1] ss:$0 sm:$0xff]  ;;  %v3566_v19 = vld [vmem:[%s4559_s4 + $0x178] sm:$0xff] }
 0x5b9   : > { %v1999_v45 = vpack.c.bf16 %v1997_v39, %v1997_v39 }
 0x5ba   : > { %v1980_v38 = vpop.f32.mrf.mxu0 }
 0x5bb   : > { %v1981_v42 = vadd.f32 %v4163_v15, %v1980_v38  ;;  %v2003_v33 = vunpack.c.l.b16 %v1999_v45  ;;  %v3565_v45 = vld [vmem:[%s4559_s4 + $0x170] sm:$0xff] }
 0x5bd   : > { %v1995_v44 = vadd.f32 %v1994_v22, %v1981_v42 }
 0x5be   : > { %v2198_v61 = vpop.f32.mrf.mxu3 }
 0x5bf   : > { %v1998_v47 = vmax.f32 %v1995_v44, 0.0  ;;  %v2199_v3 = vadd.f32 %v3586_v0, %v2198_v61  ;;  %v3563_v61 = vld [vmem:[%s4559_s4 + $0x160] sm:$0xff] }
 0x5c1   : > { %v2000_v49 = vpack.c.bf16 %v1998_v47, %v1998_v47 }
 0x5c2   : > { %v2210_v50 = vpop.f32.mrf.mxu0 }
 0x5c3   : > { %v2004_v51 = vunpack.c.l.b16 %v2000_v49  ;;  %v2211_v7 = vadd.f32 %v2210_v50, %v2197_v62  ;;  %v3564_v50 = vld [vmem:[%s4559_s4 + $0x168] sm:$0xff] }
 0x5c5   : > { %v2005_v52 = vpack.c.b16 %v2004_v51, %v2003_v33  ;;  %v2215_v17 = vmax.f32 %v2211_v7, 0.0 }
 0x5c7   : > { %2019 = vrot.lane.b32.xlu2 %v2005_v52, %s3622_s14  ;;  %v2007_v14 = vshrl.u32 %v2005_v52, 16  ;;  %v2010_v1 = vshll.u32 %v2005_v52, 16  ;;  %v3588_v52 = vld [vmem:[%s4562_s7 + $0x2] ss:$0 sm:$0xff] }
 0x5c9   : > { %v2015_v9 = vrot.slane %v2010_v1, 1  ;;  %v2009_v8 = vrot.slane %v2007_v14, 7 }
 0x5ca   : > { %v2212_v12 = vpop.f32.mrf.mxu0 }
 0x5cb   : > { %v2213_v40 = vadd.f32 %v2212_v12, %v2199_v3  ;;  %v2016_v31 = vor.u32 %v2015_v9, %v2007_v14  ;;  %v2012_v53 = vor.u32 %v2010_v1, %v2009_v8  ;;  %v3562_v9 = vld [vmem:[%s4559_s4 + $0x158] sm:$0xff] }
 0x5cc   : > { %2512 = vmatpush.bf16.msra.mxu3 %v3562_v9 }
 0x5cd   : > { %v2216_v18 = vmax.f32 %v2213_v40, 0.0  ;;  %v2018_v20 = vsel %vm3924_vm6, %v2016_v31, 0  ;;  %v3561_v40 = vld [vmem:[%s4559_s4 + $0x150] sm:$0xff] }
 0x5ce   : > { %2022 = vrot.lane.b32.xlu0 %v2018_v20, %s3621_s18 }
 0x5cf   : > { %v2218_v21 = vpack.c.bf16 %v2216_v18, %v2215_v17 }
 0x5d0   : > { %2513 = vmatpush.bf16.msra.mxu3 %v3561_v40 }
 0x5d1   : > { %2230 = vmatpush.bf16.msra.mxu1 %v2218_v21  ;;  %v3560_v21 = vld [vmem:[%s4559_s4 + $0x148] sm:$0xff] }
 0x5d4   : > { %3325 = vmatmul.msk.bf16.vlgmr.msra.gmra.mxu1 %vm2219_vm11, %v2217_v6  ;;  %2514 = vmatpush.bf16.msra.mxu3 %v3560_v21 }
 0x5d5   : > { %2324 = vmatpush.bf16.msrb.mxu1 %v3989_v5  ;;  %v2014_v5 = vsel %vm3907_vm4, 0, %v2012_v53 }
 0x5d9   : > { %2325 = vmatpush.bf16.msrb.mxu1 %v3998_v23 }
 0x5dd   : > { %2326 = vmatpush.bf16.msrb.mxu1 %v4004_v10 }
 0x5e1   : > { %2327 = vmatpush.bf16.msrb.mxu1 %v4012_v13 }
 0x5e5   : > { %2529 = vmatpush.bf16.msra.mxu1 %v3566_v19 }
 0x5e9   : > { %2530 = vmatpush.bf16.msra.mxu1 %v3565_v45  ;;  %v3609_v45 = vld [vmem:[%s4563_s8 + $0x58] sm:$0xff] }
 0x5ed   : > { %2531 = vmatpush.bf16.msra.mxu1 %v3564_v50 }
 0x5f1   : > { %2532 = vmatpush.bf16.msra.mxu1 %v3563_v61 }
 0x621   : > { %v2020_v26 = vpop.permute.xlu2 %2019 }
 0x622   : > { %v2026_v23 = vsel %vm1281_vm7, %v2014_v5, %v2020_v26 }
 0x640   : > { %v2023_v27 = vpop.permute.xlu0 %2022 }
 0x641   : > { %v2028_v10 = vsel %vm1021_vm1, %v2026_v23, %v2023_v27  ;;  %v3559_v23 = vld [vmem:[%s4559_s4 + $0x140] sm:$0xff] }
 0x642   : > { %3249 = vmatmul.msk.bf16.vlgmr.msra.gmra.mxu2 %vm1626_vm8, %v2028_v10  ;;  %2515 = vmatpush.bf16.msra.mxu3 %v3559_v23 }
 0x643   : > { %2365 = vmatpush.bf16.msra.mxu2 %v4189_v46 }
 0x647   : > { %2366 = vmatpush.bf16.msra.mxu2 %v4195_v54 }
 0x64b   : > { %2367 = vmatpush.bf16.msra.mxu2 %v4202_v56 }
 0x64f   : > { %2368 = vmatpush.bf16.msra.mxu2 %v4209_v57 }
 0x651   : > { %v2232_v13 = vpop.f32.mrf.mxu1 }
 0x652   : > { %v2236_v29 = vpack.c.bf16 %v2232_v13, %v2232_v13 }
 0x653   : > { %2369 = vmatpush.bf16.msra.mxu2 %v4216_v35 }
 0x654   : > { %3339 = vmatmul.msk.bf16.vlgmr.msrb.gmra.mxu2 %vm1281_vm7, %v2236_v29 }
 0x657   : > { %2370 = vmatpush.bf16.msra.mxu2 %v4223_v59 }
 0x659   : > { %v2234_v30 = vpop.f32.mrf.mxu1 }
 0x6c5   : > { %v2040_v38 = vpop.f32.mrf.mxu2 }
 0x6c6   : > { %v2041_v39 = vadd.f32 %v4255_v25, %v2040_v38  ;;  %v3558_v38 = vld [vmem:[%s4559_s4 + $0x138] sm:$0xff] }
 0x6c7   : > { %2516 = vmatpush.bf16.msra.mxu3 %v3558_v38 }
 0x6c8   : > { %v2050_v42 = vmul.f32 %v3587_v36, %v2041_v39 }
 0x6ca   : > { %v2052_v22 = vmul.f32 1.442695, %v2050_v42  ;;  %v3557_v42 = vld [vmem:[%s4559_s4 + $0x130] sm:$0xff] }
 0x6cb   : > { %2517 = vmatpush.bf16.msra.mxu3 %v3557_v42 }
 0x6cc   : > { %3601 = vpow2.f32 %v2052_v22  ;;  %v3556_v22 = vld [vmem:[%s4559_s4 + $0x128] sm:$0xff] }
 0x6cd   : > { %v2042_v44 = vpop.f32.mrf.mxu2 }
 0x6ce   : > { %v2043_v47 = vadd.f32 %v4255_v25, %v2042_v44 }
 0x6cf   : > { %2518 = vmatpush.bf16.msra.mxu3 %v3556_v22 }
 0x6d0   : > { %v2051_v49 = vmul.f32 %v3587_v36, %v2043_v47  ;;  %v2539_v36 = vld [vmem:[%s4557_s2] sm:$0x3] }
 0x6d2   : > { %v3602_v33 = vpop.eup %3601  ;;  %v2054_v0 = vmul.f32 1.442695, %v2051_v49 }
 0x6d3   : > { %v2056_v51 = vsel %vm932_vm9, %v3602_v33, %v2041_v39 }
 0x6d4   : > { %2716 = vst.msk [vmem:[%s4269_s16 + $0x20] sm:$0xff] %vm2711_vm10, %v2056_v51  ;;  %3603 = vpow2.f32 %v2054_v0 }
 0x6d7   : > { %v2271_v62 = vpop.f32.mrf.mxu2 }
 0x6d8   : > { %v2272_v14 = vadd.f32 %v3588_v52, %v2271_v62 }
 0x6da   : > { %v3604_v1 = vpop.eup %3603  ;;  %v2275_v3 = vmax.f32 %v2272_v14, 0.0 }
 0x6db   : > { %v2057_v7 = vsel %vm932_vm9, %v3604_v1, %v2043_v47  ;;  %v3612_v47 = vld [vmem:[%s4563_s8 + $0x40] sm:$0xff] }
 0x6dc   : > { %2717 = vst.msk [vmem:[%s4269_s16 + $0x28] sm:$0xff] %vm2711_vm10, %v2057_v7  ;;  %v2276_v8 = vpack.c.bf16 %v2275_v3, %v2275_v3  ;;  %v2277_v12 = vadd.f32 %v2275_v3, %v3959_v55 }
 0x6de   : > { %v2278_v31 = vpack.c.bf16 %v2277_v12, %v2277_v12  ;;  %v2386_v53 = vunpack.c.l.b16 %v2276_v8 }
 0x6df   : > { %v2273_v17 = vpop.f32.mrf.mxu2 }
 0x6e0   : > { %v2280_v18 = vunpack.c.l.b16 %v2278_v31  ;;  %v2387_v20 = vpack.c.b16 %v2386_v53, %v2386_v53 }
 0x6e2   : > { %2401 = vrot.lane.b32.xlu2 %v2387_v20, %s3621_s18  ;;  %v2389_v6 = vshrl.u32 %v2387_v20, 16  ;;  %v2281_v2 = vpack.c.b16 %v2280_v18, %v2280_v18  ;;  %v2392_v55 = vshll.u32 %v2387_v20, 16 }
 0x6e4   : > { %2298 = vrot.lane.b32.xlu1 %v2281_v2, %s3621_s18  ;;  %v2283_v11 = vshrl.u32 %v2281_v2, 16  ;;  %v2286_v26 = vshll.u32 %v2281_v2, 16  ;;  %v2391_v5 = vrot.slane %v2389_v6, 7  ;;  %v2397_v19 = vrot.slane %v2392_v55, 1 }
 0x6e6   : > { %v2291_v27 = vrot.slane %v2286_v26, 1  ;;  %v2394_v10 = vor.u32 %v2392_v55, %v2391_v5  ;;  %v2285_v13 = vrot.slane %v2283_v11, 7  ;;  %v2398_v44 = vor.u32 %v2397_v19, %v2389_v6 }
 0x6e8   : > { %v2292_v29 = vor.u32 %v2291_v27, %v2283_v11  ;;  %v2288_v30 = vor.u32 %v2286_v26, %v2285_v13  ;;  %v2396_v49 = vsel %vm3907_vm4, 0, %v2394_v10 }
 0x6ea   : > { %v2297_v39 = vsel %vm4430_vm14, %v2292_v29, 0  ;;  %v2290_v33 = vsel %vm3907_vm4, 0, %v2288_v30 }
 0x6eb   : > { %3340 = vmatmul.msk.bf16.vlgmr.msrb.gmra.mxu1 %vm1021_vm1, %v2297_v39 }
 0x6ec   : > { %2632 = vmatpush.bf16.msrb.mxu1 %v4032_v32  ;;  %v3555_v32 = vld [vmem:[%s4559_s4 + $0x120] sm:$0xff] }
 0x6ed   : > { %2519 = vmatpush.bf16.msra.mxu3 %v3555_v32 }
 0x6f0   : > { %2633 = vmatpush.bf16.msrb.mxu1 %v4039_v34  ;;  %v2400_v34 = vsel %vm4430_vm14, %v2398_v44, 0 }
 0x6f1   : > { %2649 = vmatpush.bf16.msrb.mxu3 %v3609_v45  ;;  %v899_v45 = vadd.f32 %v3980_v60, %v3961_v58 }
 0x6f4   : > { %2634 = vmatpush.bf16.msrb.mxu1 %v4052_v63  ;;  %v3610_v63 = vld [vmem:[%s4563_s8 + $0x50] sm:$0xff] }
 0x6f5   : > { %2650 = vmatpush.bf16.msrb.mxu3 %v3610_v63 }
 0x6f8   : > { %2635 = vmatpush.bf16.msrb.mxu1 %v4067_v16  ;;  %v3611_v16 = vld [vmem:[%s4563_s8 + $0x48] sm:$0xff] }
 0x6f9   : > { %2651 = vmatpush.bf16.msrb.mxu3 %v3611_v16 }
 0x6fb   : > { %3416 = vmatmul.msk.bf16.vlgmr.msra.gmra.mxu1 %vm1021_vm1, %v2400_v34  ;;  %v3591_v34 = vld [vmem:[%s4562_s7 + $0x3] ss:$0 sm:$0xff] }
 0x6fc   : > { %2636 = vmatpush.bf16.msrb.mxu1 %v4080_v37 }
 0x6fd   : > { %2652 = vmatpush.bf16.msrb.mxu3 %v3612_v47  ;;  %v928_v47 = vadd.f32 %v3984_v4, %v899_v45 }
 0x700   : > { %2637 = vmatpush.bf16.msrb.mxu1 %v4090_v24 }
 0x704   : > { %2638 = vmatpush.bf16.msrb.mxu1 %v4096_v41 }
 0x708   : > { %2639 = vmatpush.bf16.msrb.mxu1 %v4102_v43  ;;  %v3589_v43 = vld [vmem:[%s4560_s5 + $0x3] ss:$0 sm:$0xff] }
 0x73c   : > { %v2402_v37 = vpop.permute.xlu2 %2401 }
 0x73d   : > { %v2405_v24 = vsel %vm1021_vm1, %v2396_v49, %v2402_v37 }
 0x73e   : > { %2520 = vmatmul.bf16.vlgmr.msra.gmra.mxu3 %v2405_v24 }
 0x756   : > { %v2299_v50 = vpop.permute.xlu1 %2298 }
 0x757   : > { %v2302_v41 = vsel %vm1021_vm1, %v2290_v33, %v2299_v50 }
 0x758   : > { %2315 = vmatmul.bf16.vlgmr.msrb.gmra.mxu0 %v2302_v41 }
 0x768   : > { %v2329_v0 = vpop.f32.mrf.mxu1 }
 0x770   : > { %v2331_v51 = vpop.f32.mrf.mxu1 }
 0x778   : > { %v2534_v52 = vpop.f32.mrf.mxu1 }
 0x780   : > { %v2536_v61 = vpop.f32.mrf.mxu1 }
 0x7c1   : > { %v2521_v62 = vpop.f32.mrf.mxu3 }
 0x7c2   : > { %v2522_v14 = vadd.f32 %v3589_v43, %v2521_v62 }
 0x7c4   : > { %v2535_v1 = vadd.f32 %v2534_v52, %v2522_v14 }
 0x7c6   : > { %v2538_v3 = vmax.f32 %v2535_v1, 0.0 }
 0x7c8   : > { %v2540_v7 = vpack.c.bf16 %v2538_v3, %v2538_v3 }
 0x7c9   : > { %v2523_v9 = vpop.f32.mrf.mxu3 }
 0x7ca   : > { %v2547_v8 = vsel %vm2294_vm12, %v2540_v7, 0 }
 0x7cb   : > { %2556 = vmatpush.bf16.msrb.mxu2 %v2547_v8 }
 0x7d5   : > { %v2316_v12 = vpop.f32.mrf.mxu0 }
 0x7d6   : > { %v2317_v40 = vadd.f32 %v4163_v15, %v2316_v12 }
 0x7d8   : > { %v2330_v31 = vadd.f32 %v2329_v0, %v2317_v40 }
 0x7da   : > { %v2333_v53 = vmax.f32 %v2330_v31, 0.0 }
 0x7dc   : > { %v2334_v17 = vpack.c.bf16 %v2333_v53, %v2333_v53 }
 0x7dd   : > { %v2318_v18 = vpop.f32.mrf.mxu0 }
 0x7de   : > { %v2336_v20 = vunpack.c.l.b16 %v2334_v17 }
 0x7e0   : > { %v2337_v21 = vpack.c.b16 %v2336_v20, %v2336_v20 }
 0x7e2   : > { %2351 = vrot.lane.b32.xlu0 %v2337_v21, %s3622_s14  ;;  %v2339_v6 = vshrl.u32 %v2337_v21, 16  ;;  %v2342_v2 = vshll.u32 %v2337_v21, 16 }
 0x7e4   : > { %v2347_v55 = vrot.slane %v2342_v2, 1  ;;  %v2341_v11 = vrot.slane %v2339_v6, 7 }
 0x7e6   : > { %v2348_v26 = vor.u32 %v2347_v55, %v2339_v6  ;;  %v2344_v5 = vor.u32 %v2342_v2, %v2341_v11 }
 0x7e8   : > { %v2350_v23 = vsel %vm4430_vm14, %v2348_v26, 0  ;;  %v2346_v10 = vsel %vm3907_vm4, 0, %v2344_v5 }
 0x7e9   : > { %2354 = vrot.lane.b32.xlu1 %v2350_v23, %s3621_s18 }
 0x854   : > { %v2352_v27 = vpop.permute.xlu0 %2351 }
 0x855   : > { %v2358_v13 = vsel %vm1281_vm7, %v2346_v10, %v2352_v27 }
 0x85b   : > { %v2355_v29 = vpop.permute.xlu1 %2354 }
 0x85c   : > { %v2360_v30 = vsel %vm1021_vm1, %v2358_v13, %v2355_v29  ;;  %v3592_v13 = vld [vmem:[%s4567_s12 + $0x3] ss:$0 sm:$0xff] }
 0x85d   : > { %3341 = vmatmul.msk.bf16.vlgmr.msra.gmra.mxu2 %vm1626_vm8, %v2360_v30 }
 0x85e   : > { %2690 = vmatpush.bf16.msra.mxu2 %v4189_v46  ;;  %v3568_v46 = vld [vmem:[%s4561_s6 + $0x38] sm:$0xff] }
 0x85f   : > { %2594 = vmatpush.bf16.msra.mxu0 %v3568_v46 }
 0x862   : > { %2691 = vmatpush.bf16.msra.mxu2 %v4195_v54  ;;  %v3567_v54 = vld [vmem:[%s4561_s6 + $0x30] sm:$0xff] }
 0x863   : > { %2595 = vmatpush.bf16.msra.mxu0 %v3567_v54 }
 0x866   : > { %2692 = vmatpush.bf16.msra.mxu2 %v4202_v56  ;;  %v3590_v56 = vld [vmem:[%s4567_s12 + $0x2] ss:$0 sm:$0xff] }
 0x86a   : > { %2693 = vmatpush.bf16.msra.mxu2 %v4209_v57 }
 0x86d   : > { %3417 = vmatmul.msk.bf16.vlgmr.msrb.gmra.mxu2 %vm2541_vm15, %v2539_v36 }
 0x86e   : > { %2694 = vmatpush.bf16.msra.mxu2 %v4216_v35 }
 0x872   : > { %2695 = vmatpush.bf16.msra.mxu2 %v4223_v59 }
 0x8e0   : > { %v2372_v57 = vpop.f32.mrf.mxu2 }
 0x8e1   : > { %v2373_v38 = vadd.f32 %v4255_v25, %v2372_v57 }
 0x8e3   : > { %v2381_v35 = vmul.f32 %v3590_v56, %v2373_v38 }
 0x8e5   : > { %v2382_v39 = vmul.f32 1.442695, %v2381_v35 }
 0x8e7   : > { %3605 = vpow2.f32 %v2382_v39 }
 0x8e8   : > { %v2374_v59 = vpop.f32.mrf.mxu2 }
 0x8ed   : > { %v3606_v42 = vpop.eup %3605 }
 0x8ee   : > { %v2384_v22 = vsel %vm932_vm9, %v3606_v42, %v2373_v38 }
 0x8ef   : > { %2718 = vst.msk [vmem:[%s4269_s16 + $0x30] sm:$0xff] %vm2711_vm10, %v2384_v22 }
 0x8f0   : > { %v2558_v19 = vpop.f32.mrf.mxu2 }
 0x8f1   : > { %v2562_v32 = vpack.c.bf16 %v2558_v19, %v2558_v19 }
 0x8f3   : > { %3431 = vmatmul.msk.bf16.vlgmr.msra.gmra.mxu0 %vm1281_vm7, %v2562_v32 }
 0x8f8   : > { %v2560_v44 = vpop.f32.mrf.mxu2 }
 0x970   : > { %v2597_v63 = vpop.f32.mrf.mxu0 }
 0x971   : > { %v2598_v16 = vadd.f32 %v3591_v34, %v2597_v63 }
 0x973   : > { %v2601_v37 = vmax.f32 %v2598_v16, 0.0 }
 0x975   : > { %v2602_v49 = vadd.f32 %v2601_v37, %v928_v47 }
 0x977   : > { %v2603_v24 = vpack.c.bf16 %v2602_v49, %v2602_v49 }
 0x978   : > { %v2599_v50 = vpop.f32.mrf.mxu0 }
 0x979   : > { %v2605_v33 = vunpack.c.l.b16 %v2603_v24 }
 0x97b   : > { %v2606_v41 = vpack.c.b16 %v2605_v33, %v2605_v33 }
 0x97d   : > { %2623 = vrot.lane.b32.xlu2 %v2606_v41, %s3621_s18  ;;  %v2608_v0 = vshrl.u32 %v2606_v41, 16  ;;  %v2611_v51 = vshll.u32 %v2606_v41, 16 }
 0x97f   : > { %v2616_v52 = vrot.slane %v2611_v51, 1  ;;  %v2610_v61 = vrot.slane %v2608_v0, 7 }
 0x981   : > { %v2617_v60 = vor.u32 %v2616_v52, %v2608_v0  ;;  %v2613_v4 = vor.u32 %v2611_v51, %v2610_v61 }
 0x983   : > { %v2622_v43 = vsel %vm4523_vm3, %v2617_v60, 0  ;;  %v2615_v14 = vsel %vm3907_vm4, 0, %v2613_v4 }
 0x984   : > { %3432 = vmatmul.msk.bf16.vlgmr.msrb.gmra.mxu3 %vm1021_vm1, %v2622_v43 }
 0x9d7   : > { %v2624_v62 = vpop.permute.xlu2 %2623 }
 0x9d8   : > { %v2627_v1 = vsel %vm1021_vm1, %v2615_v14, %v2624_v62 }
 0x9d9   : > { %2640 = vmatmul.bf16.vlgmr.msrb.gmra.mxu1 %v2627_v1 }
 0xa07   : > { %v2654_v3 = vpop.f32.mrf.mxu3 }
 0xa0f   : > { %v2656_v7 = vpop.f32.mrf.mxu3 }
 0xa56   : > { %v2641_v9 = vpop.f32.mrf.mxu1 }
 0xa57   : > { %v2642_v8 = vadd.f32 %v4163_v15, %v2641_v9 }
 0xa59   : > { %v2655_v12 = vadd.f32 %v2654_v3, %v2642_v8 }
 0xa5b   : > { %v2658_v40 = vmax.f32 %v2655_v12, 0.0 }
 0xa5d   : > { %v2659_v31 = vpack.c.bf16 %v2658_v40, %v2658_v40 }
 0xa5e   : > { %v2643_v53 = vpop.f32.mrf.mxu1 }
 0xa5f   : > { %v2661_v17 = vunpack.c.l.b16 %v2659_v31 }
 0xa61   : > { %v2662_v18 = vpack.c.b16 %v2661_v17, %v2661_v17 }
 0xa63   : > { %2676 = vrot.lane.b32.xlu0 %v2662_v18, %s3622_s14  ;;  %v2664_v20 = vshrl.u32 %v2662_v18, 16  ;;  %v2667_v21 = vshll.u32 %v2662_v18, 16 }
 0xa65   : > { %v2672_v6 = vrot.slane %v2667_v21, 1  ;;  %v2666_v2 = vrot.slane %v2664_v20, 7 }
 0xa67   : > { %v2673_v55 = vor.u32 %v2672_v6, %v2664_v20  ;;  %v2669_v11 = vor.u32 %v2667_v21, %v2666_v2 }
 0xa69   : > { %v2675_v26 = vsel %vm4523_vm3, %v2673_v55, 0  ;;  %v2671_v5 = vsel %vm3907_vm4, 0, %v2669_v11 }
 0xa6a   : > { %2679 = vrot.lane.b32.xlu1 %v2675_v26, %s3621_s18 }
 0xad5   : > { %v2677_v15 = vpop.permute.xlu0 %2676 }
 0xad6   : > { %v2683_v23 = vsel %vm1281_vm7, %v2671_v5, %v2677_v15 }
 0xadc   : > { %v2680_v27 = vpop.permute.xlu1 %2679 }
 0xadd   : > { %v2685_v10 = vsel %vm1021_vm1, %v2683_v23, %v2680_v27 }
 0xade   : > { %3433 = vmatmul.msk.bf16.vlgmr.msra.gmra.mxu2 %vm1626_vm8, %v2685_v10 }
 0xb61   : > { %v2697_v29 = vpop.f32.mrf.mxu2 }
 0xb62   : > { %v2698_v30 = vadd.f32 %v4255_v25, %v2697_v29 }
 0xb64   : > { %v2706_v36 = vmul.f32 %v3592_v13, %v2698_v30 }
 0xb66   : > { %v2707_v46 = vmul.f32 1.442695, %v2706_v36 }
 0xb68   : > { %3607 = vpow2.f32 %v2707_v46 }
 0xb69   : > { %v2699_v48 = vpop.f32.mrf.mxu2 }
 0xb6e   : > { %v3608_v54 = vpop.eup %3607 }
 0xb6f   : > { %v2709_v56 = vsel %vm932_vm9, %v3608_v54, %v2698_v30 }
 0xb70   : > { %v2710_v57 = vsel %vm2294_vm12, %v2709_v56, 0.0 }
 0xb71   : > { %2719 = vst.msk [vmem:[%s4269_s16 + $0x38] sm:$0xff] %vm2711_vm10, %v2710_v57 }
 0xb72 PF: > { %s23_s25 = sadd.s32 1, %s3619_s25  }
 0xb73   : > { %p20_p4 = scmp.ge.s32.totalorder %s23_s25, 4  }
 0xb75   :  { %22 = sbr.rel (!%p20_p4) target bundleno = 1 (0x1), region = 120 }

</bundles_post_ra>
